<compile_context>
chip_gen: v7x
topology: tpu7x:2x2x1
jax: 0.10.0
libtpu: 0.0.40
codegen_flags: <defaults>
</compile_context>

<pallas_src>
import math
from functools import partial

import jax
import jax.numpy as jnp
from jax.experimental import pallas as pl
from jax.experimental.pallas import tpu as pltpu

LEAKY_SLOPE = 0.2
INV_SQRT2 = 1.0 / math.sqrt(2.0)


# ---------------------------------------------------------------------------
# AddCoords semantics (derived from the torch module):
#   xx_channel[b, 0, h, w] = 2*h/(H-1) - 1   (varies along H = x_dim)
#   yy_channel[b, 0, h, w] = 2*w/(W-1) - 1   (varies along W = y_dim)
#   concat order: [input..., xx, yy]
# TODO(synk): like torch, H==1 or W==1 divides by zero (inf/nan) — unchanged.
# ---------------------------------------------------------------------------
def _coord_planes(H, W, dtype=jnp.float32):
    xx = (jnp.arange(H, dtype=dtype) / (H - 1)) * 2.0 - 1.0
    yy = (jnp.arange(W, dtype=dtype) / (W - 1)) * 2.0 - 1.0
    return jnp.stack([jnp.broadcast_to(xx[:, None], (H, W)),
                      jnp.broadcast_to(yy[None, :], (H, W))], axis=-1)  # (H,W,2)


def add_coords_nhwc(x):  # used only by the pure-JAX reference
    B, H, W, _ = x.shape
    coords = jnp.broadcast_to(_coord_planes(H, W, x.dtype)[None], (B, H, W, 2))
    return jnp.concatenate([x, coords], axis=-1)


# ---------------------------------------------------------------------------
# Fused kernel: Bt batch-packed images per grid step, everything stays in VMEM.
# ---------------------------------------------------------------------------
def _fused_block_kernel(x_ref, w1_ref, cb1_ref, w2_ref, cb2_ref, *rest,
                        K, H, W, cin, cout, p, q, bt, has_proj, downsample,
                        pool_cols):
    r = 0
    if has_proj:
        wp_ref, bp_ref = rest[r], rest[r + 1]
        r += 2
    if downsample:
        pr_ref = rest[r]
        r += 1
        if pool_cols:
            pc_ref = rest[r]
            r += 1
    o_ref, pad1_ref, pad2_ref = rest[r], rest[r + 1], rest[r + 2]

    M = bt * H
    wcin, wcout = W * cin, W * cout

    # Zero only the 2p halo rows (interior is fully overwritten below).
    # Re-zeroed every step so megacore batch sharding stays correct.
    pad1_ref[:, pl.ds(q - p, p), :] = jnp.zeros((bt, p, wcin), pad1_ref.dtype)
    pad1_ref[:, pl.ds(q + H, p), :] = jnp.zeros((bt, p, wcin), pad1_ref.dtype)
    pad2_ref[:, pl.ds(q - p, p), :] = jnp.zeros((bt, p, wcout), pad2_ref.dtype)
    pad2_ref[:, pl.ds(q + H, p), :] = jnp.zeros((bt, p, wcout), pad2_ref.dtype)

    x3d = x_ref[...]                               # (bt, H, W*cin), compute dtype
    pad1_ref[:, pl.ds(q, H), :] = x3d              # lane-offset-0, dtype-matched

    # ---------------- CoordConv #1 + LeakyReLU ----------------
    # coord channels' conv + bias seed the f32 accumulator (cb1 is (bt*H, W*cout)).
    # TODO(synk): fold the K vertical taps into one (M, K*W*cin) matmul per conv
    # to raise the contraction depth closer to the 256-deep MXU on v6e/v7x.
    acc = cb1_ref[...]
    for t in range(K):
        lhs = pad1_ref[:, pl.ds(q - p + t, H), :].reshape(M, wcin)
        acc = acc + jnp.dot(lhs, w1_ref[t], preferred_element_type=jnp.float32)
    h1 = jnp.where(acc >= 0, acc, LEAKY_SLOPE * acc)          # (bt*H, W*cout) f32

    # ---------------- CoordConv #2 + LeakyReLU ----------------
    pad2_ref[:, pl.ds(q, H), :] = h1.reshape(bt, H, wcout).astype(pad2_ref.dtype)
    acc2 = cb2_ref[...]
    for t in range(K):
        lhs = pad2_ref[:, pl.ds(q - p + t, H), :].reshape(M, wcout)
        acc2 = acc2 + jnp.dot(lhs, w2_ref[t], preferred_element_type=jnp.float32)
    h2 = jnp.where(acc2 >= 0, acc2, LEAKY_SLOPE * acc2)       # (bt*H, W*cout) f32

    # ---------------- residual merge + optional 2x2 pool epilogue ----------------
    xf = x3d.reshape(M, wcin)
    if has_proj:
        # 1x1 conv on the identity path (block-diagonalized to (W*cin, W*cout)).
        ident = jnp.dot(xf, wp_ref[...], preferred_element_type=jnp.float32)
        ident = ident + bp_ref[...]
    else:
        ident = xf.astype(jnp.float32)             # requires cin == cout

    y = (h2 + ident) * INV_SQRT2                   # (bt*H, W*cout) f32

    if downsample:
        # proj/merge commute with the 2x2 average pool, so pooling the merged
        # slab matches torch's "pool y, pool identity, then proj, then add".
        y = jnp.dot(pr_ref[...], y, preferred_element_type=jnp.float32)   # rows
        if pool_cols:
            y = jnp.dot(y, pc_ref[...], preferred_element_type=jnp.float32)  # cols

    ho = H // 2 if downsample else H
    o_ref[...] = y.reshape(bt, ho, y.shape[-1]).astype(o_ref.dtype)


# ---------------------------------------------------------------------------
# Batch-tile selection and batch-independent constants (tiny, plain JAX).
# ---------------------------------------------------------------------------
def _pick_batch_tile(B, H, target_rows=256):
    # TODO(synk): H % 8 != 0 would make the (bt, H) -> (bt*H) merges real
    # relayouts; keep one image per step in that case.
    if H % 8 != 0:
        return 1
    bt = max(1, min(B, max(1, target_rows // H)))
    while B % bt:
        bt -= 1
    # Prefer >= 2 grid steps (v7x megacore) only while M stays MXU-sized.
    if B // bt < 2 and bt % 2 == 0 and (bt // 2) * H >= 128:
        bt //= 2
    return bt


def _precompute_constants(params, H, W, *, kernel_size, inplanes, planes,
                          downsample, pool_cols_in_kernel, bt, compute_dtype):
    K = kernel_size
    p = K // 2
    dn = ("NHWC", "HWIO", "NHWC")
    coords = _coord_planes(H, W)[None]                          # (1, H, W, 2)

    def coord_bias(w_full, b):
        # Conv contribution of the fixed coordinate channels + bias: the
        # (bt*H, W*planes) f32 plane that seeds the in-kernel accumulator.
        wc = w_full[:, :, -2:, :]
        cb = jax.lax.conv_general_dilated(coords, wc, (1, 1), [(p, p), (p, p)],
                                          dimension_numbers=dn)[0]
        cb = (cb + b.reshape(1, 1, -1)).reshape(H, W * planes)
        return jnp.tile(cb, (bt, 1)).astype(jnp.float32)

    def banded(w_main):
        # bd[i, v*cin + c, w*cout + o] = w[i, v - w + p, c, o] for 0 <= v-w+p < K.
        # Horizontal zero padding is absorbed (out-of-range taps never match),
        # so the kernel contracts over W*cin at lane offset 0.
        # TODO(synk): for large W*C, W-tile the lane axis with a second grid
        # axis (bd is O(K*(W*C)^2)) — required before realistic shapes on
        # v7x's 64 MiB VMEM.
        cin_ = w_main.shape[2]
        jv = jnp.arange(K)[:, None] + jnp.arange(W)[None, :] - p          # (K, W)
        shift = (jv[:, :, None] == jnp.arange(W)[None, None, :]).astype(w_main.dtype)
        bd = jnp.einsum("jwv,ijco->ivcwo", shift, w_main)
        return bd.reshape(K, W * cin_, W * planes).astype(compute_dtype)

    consts = {
        "cb1": coord_bias(params["w1"], params["b1"]),
        "cb2": coord_bias(params["w2"], params["b2"]),
        "w1bd": banded(params["w1"][:, :, :inplanes, :]),
        "w2bd": banded(params["w2"][:, :, :planes, :]),
    }
    if "wp" in params:
        eye_w = jnp.eye(W, dtype=params["wp"].dtype)
        consts["wpbd"] = jnp.einsum("wv,co->wcvo", eye_w, params["wp"]).reshape(
            W * inplanes, W * planes).astype(compute_dtype)
        consts["bp"] = jnp.tile(params["bp"], W).reshape(1, W * planes).astype(jnp.float32)
    if downsample:
        Ho, Wo = H // 2, W // 2
        rows = jnp.arange(H)[None, :]
        pr = (((2 * jnp.arange(Ho)[:, None]) == rows) |
              ((2 * jnp.arange(Ho)[:, None] + 1) == rows)).astype(jnp.float32) * 0.5
        # block-diagonal over the Bt packed images: (bt*Ho, bt*H)
        consts["pr"] = jnp.kron(jnp.eye(bt, dtype=jnp.float32), pr)
        if pool_cols_in_kernel:
            cols = jnp.arange(W)[:, None]
            sel = (((2 * jnp.arange(Wo)[None, :]) == cols) |
                   ((2 * jnp.arange(Wo)[None, :] + 1) == cols)).astype(jnp.float32) * 0.5
            consts["pc"] = jnp.einsum("wv,oq->wovq", sel,
                                      jnp.eye(planes, dtype=jnp.float32)).reshape(
                W * planes, Wo * planes)
    return consts


# ---------------------------------------------------------------------------
# Full ResidualCoordConvBlock forward (NCHW in / NCHW out).
# ---------------------------------------------------------------------------
def residual_coord_conv_block(x_nchw, params, *, kernel_size=3, downsample=False,
                              compute_dtype=jnp.bfloat16, batch_rows_target=256):
    # TODO(synk): if the surrounding model can consume NHWC (or the lane-dense
    # (B, H, W*C) form) end-to-end, drop the two boundary transposes below.
    B, Cin, H, W = x_nchw.shape
    K = kernel_size
    assert K % 2 == 1, "only odd kernel sizes supported (module default 3)"
    p = K // 2
    Cout = params["b1"].shape[0]
    has_proj = "wp" in params
    if not has_proj:
        assert Cin == Cout
    if downsample:
        assert H % 2 == 0 and W % 2 == 0
    Ho, Wo = (H // 2, W // 2) if downsample else (H, W)

    # Keep kernel output stores lane-dense: pool columns in-kernel only when
    # the pooled lane width stays >= 128; otherwise finish the (linear) column
    # pool in the wrapper.
    pool_cols_in_kernel = downsample and (Wo * Cout >= 128)
    Wk = Wo if pool_cols_in_kernel else W

    bt = _pick_batch_tile(B, H, batch_rows_target)
    grid = (B // bt,)

    # Sub-32-bit dtypes pack along sublanes: align the interior-row offset so
    # the big (bt, H, :) scratch store starts on a packed-sublane boundary.
    packing = max(1, 4 // jnp.dtype(compute_dtype).itemsize)
    q = ((p + packing - 1) // packing) * packing
    Hb = H + p + q                                   # scratch rows per image

    c = _precompute_constants(params, H, W, kernel_size=K, inplanes=Cin,
                              planes=Cout, downsample=downsample,
                              pool_cols_in_kernel=pool_cols_in_kernel,
                              bt=bt, compute_dtype=compute_dtype)

    # NCHW -> (B, H, W*Cin): channels fastest inside the lane dim; cast once.
    x2d = jnp.transpose(x_nchw, (0, 2, 3, 1)).reshape(B, H, W * Cin)
    x2d = x2d.astype(compute_dtype)

    operands = [x2d, c["w1bd"], c["cb1"], c["w2bd"], c["cb2"]]
    const_shapes = [c["w1bd"].shape, c["cb1"].shape, c["w2bd"].shape, c["cb2"].shape]
    if has_proj:
        operands += [c["wpbd"], c["bp"]]
        const_shapes += [c["wpbd"].shape, c["bp"].shape]
    if downsample:
        operands += [c["pr"]]
        const_shapes += [c["pr"].shape]
        if pool_cols_in_kernel:
            operands += [c["pc"]]
            const_shapes += [c["pc"].shape]

    kern = partial(_fused_block_kernel, K=K, H=H, W=W, cin=Cin, cout=Cout,
                   p=p, q=q, bt=bt, has_proj=has_proj, downsample=downsample,
                   pool_cols=pool_cols_in_kernel)

    out_shape = jax.ShapeDtypeStruct((B, Ho, Wk * Cout), x_nchw.dtype)
    out_spec = pl.BlockSpec((bt, Ho, Wk * Cout), lambda g: (g, 0, 0))
    scratch_shapes = [pltpu.VMEM((bt, Hb, W * Cin), compute_dtype),
                      pltpu.VMEM((bt, Hb, W * Cout), compute_dtype)]

    # Per-step VMEM footprint estimate -> explicit scoped-VMEM limit.
    cbytes = sum(int(a.size) * a.dtype.itemsize for a in operands[1:])
    xbytes = bt * H * W * Cin * jnp.dtype(compute_dtype).itemsize
    obytes = bt * Ho * Wk * Cout * jnp.dtype(x_nchw.dtype).itemsize
    sbytes = bt * Hb * W * (Cin + Cout) * jnp.dtype(compute_dtype).itemsize
    est = 2 * (xbytes + obytes + cbytes) + sbytes
    vmem_limit = int(min(96 << 20, max(32 << 20, 2 * est)))

    def run(single_buffer_constants):
        def cspec(shape):
            imap = lambda g: (0,) * len(shape)
            if single_buffer_constants:
                # grid-invariant operands: one VMEM buffer is enough.
                return pl.BlockSpec(shape, imap,
                                    pipeline_mode=pl.Buffered(buffer_count=1))
            return pl.BlockSpec(shape, imap)

        in_specs = [pl.BlockSpec((bt, H, W * Cin), lambda g: (g, 0, 0))]
        in_specs += [cspec(s) for s in const_shapes]
        return pl.pallas_call(
            kern,
            out_shape=out_shape,
            grid=grid,
            in_specs=in_specs,
            out_specs=out_spec,
            scratch_shapes=scratch_shapes,
            compiler_params=pltpu.CompilerParams(
                dimension_semantics=("parallel",),
                vmem_limit_bytes=vmem_limit),
        )(*operands)

    try:
        out2d = jax.block_until_ready(run(True))
    except Exception:
        # pipeline_mode=pl.Buffered(1) unsupported on this jax version:
        # fall back to the default double-buffered constants.
        out2d = run(False)

    if downsample and not pool_cols_in_kernel:
        # Finish the 2x2 pool: columns were left unpooled so the kernel's
        # output stores stayed 128-lane dense.
        y = out2d.reshape(B, Ho, Wo, 2, Cout).mean(axis=3)
    else:
        y = out2d.reshape(B, Ho, Wk, Cout)
    return jnp.transpose(y, (0, 3, 1, 2))            # NHWC -> NCHW


# ---------------------------------------------------------------------------
# Deterministic synthetic params (shapes match the torch module; HWIO weights).
# ---------------------------------------------------------------------------
def init_params(key, inplanes, planes, kernel_size=3):
    k1, k2, k3, k4, k5, k6 = jax.random.split(key, 6)
    cin1 = inplanes + 2           # CoordConv adds 2 coord channels
    cin2 = planes + 2
    s1 = 1.0 / math.sqrt(cin1 * kernel_size * kernel_size)
    s2 = 1.0 / math.sqrt(cin2 * kernel_size * kernel_size)
    params = {
        "w1": jax.random.normal(k1, (kernel_size, kernel_size, cin1, planes), jnp.float32) * s1,
        "b1": jax.random.normal(k2, (planes,), jnp.float32) * s1,
        "w2": jax.random.normal(k3, (kernel_size, kernel_size, cin2, planes), jnp.float32) * s2,
        "b2": jax.random.normal(k4, (planes,), jnp.float32) * s2,
    }
    if inplanes != planes:        # self.proj = Conv2d(inplanes, planes, 1)
        sp = 1.0 / math.sqrt(inplanes)
        params["wp"] = jax.random.normal(k5, (inplanes, planes), jnp.float32) * sp
        params["bp"] = jax.random.normal(k6, (planes,), jnp.float32) * sp
    return params


def avg_pool2(x):  # reference-only helper (NHWC)
    B, H, W, C = x.shape
    return x.reshape(B, H // 2, 2, W // 2, 2, C).mean(axis=(2, 4))


# Pure-JAX reference (lax.conv) mirroring the torch module exactly.
def reference_forward(x_nchw, params, *, kernel_size=3, downsample=False):
    p = kernel_size // 2
    dn = ("NHWC", "HWIO", "NHWC")
    x = jnp.transpose(x_nchw, (0, 2, 3, 1))

    def conv(h, w, b):
        out = jax.lax.conv_general_dilated(h, w, (1, 1), [(p, p), (p, p)],
                                           dimension_numbers=dn)
        return out + b.reshape(1, 1, 1, -1)

    h = add_coords_nhwc(x)
    h = conv(h, params["w1"], params["b1"])
    h = jnp.where(h >= 0, h, LEAKY_SLOPE * h)
    h = add_coords_nhwc(h)
    h = conv(h, params["w2"], params["b2"])
    h = jnp.where(h >= 0, h, LEAKY_SLOPE * h)
    ident = x
    if downsample:
        h = avg_pool2(h)
        ident = avg_pool2(ident)
    if "wp" in params:
        ident = jnp.einsum("bhwc,co->bhwo", ident, params["wp"]) + params["bp"]
    y = (h + ident) * INV_SQRT2
    return jnp.transpose(y, (0, 3, 1, 2))


if __name__ == "__main__":
    key = jax.random.PRNGKey(0)
    kx, kp, kx2, kp2 = jax.random.split(key, 4)

    B, H, W = 2, 16, 16

    # --- config 1: proj branch (inplanes != planes), f32 operands ----------
    inplanes, planes = 4, 8
    x = jax.random.normal(kx, (B, inplanes, H, W), jnp.float32)
    params = init_params(kp, inplanes, planes, kernel_size=3)
    ref = reference_forward(x, params)
    y = jax.block_until_ready(
        residual_coord_conv_block(x, params, compute_dtype=jnp.float32))
    assert y.shape == (B, planes, H, W), y.shape
    err1 = float(jnp.max(jnp.abs(y - ref)))
    assert jnp.allclose(y, ref, atol=2e-2, rtol=2e-2), f"cfg1 max_err={err1}"

    # --- config 2: identity branch (inplanes == planes) + downsample, f32 ---
    inplanes2 = planes2 = 8
    x2 = jax.random.normal(kx2, (B, inplanes2, H, W), jnp.float32)
    params2 = init_params(kp2, inplanes2, planes2, kernel_size=3)
    ref2 = reference_forward(x2, params2, downsample=True)
    y2 = jax.block_until_ready(
        residual_coord_conv_block(x2, params2, downsample=True,
                                  compute_dtype=jnp.float32))
    assert y2.shape == (B, planes2, H // 2, W // 2), y2.shape
    err2 = float(jnp.max(jnp.abs(y2 - ref2)))
    assert jnp.allclose(y2, ref2, atol=2e-2, rtol=2e-2), f"cfg2 max_err={err2}"

    # --- config 3: default bf16 operand path (v6e/v7x), loose tolerance -----
    y3 = jax.block_until_ready(residual_coord_conv_block(x, params))
    err3 = float(jnp.max(jnp.abs(y3 - ref)))
    assert jnp.allclose(y3, ref, atol=1e-1, rtol=1e-1), f"cfg3 max_err={err3}"

    y4 = jax.block_until_ready(
        residual_coord_conv_block(x2, params2, downsample=True))
    err4 = float(jnp.max(jnp.abs(y4 - ref2)))
    assert jnp.allclose(y4, ref2, atol=1e-1, rtol=1e-1), f"cfg4 max_err={err4}"

    print("KERNEL_OK")
</pallas_src>

<mosaic_0001>
module attributes {stable_mosaic.version = 11 : i64} {
  func.func @_fused_block_kernel(%arg0: i32, %arg1: memref<2x16x64xf32, #tpu.memory_space<vmem>>, %arg2: memref<3x64x128xf32, #tpu.memory_space<vmem>>, %arg3: memref<32x128xf32, #tpu.memory_space<vmem>>, %arg4: memref<3x128x128xf32, #tpu.memory_space<vmem>>, %arg5: memref<32x128xf32, #tpu.memory_space<vmem>>, %arg6: memref<64x128xf32, #tpu.memory_space<vmem>>, %arg7: memref<1x128xf32, #tpu.memory_space<vmem>>, %arg8: memref<2x16x128xf32, #tpu.memory_space<vmem>>, %arg9: memref<2x18x64xf32, #tpu.memory_space<vmem>>, %arg10: memref<2x18x128xf32, #tpu.memory_space<vmem>>) attributes {dimension_semantics = [#tpu.dimension_semantics<parallel>], iteration_bounds = array<i64: 1>, scalar_prefetch = 0 : i64, scratch_operands = 2 : i64, tpu.core_type = #tpu.core_type<tc>, window_params = [{transform_indices = @transform_0, window_bounds = array<i64: 2, 16, 64>}, {pipeline_mode = #tpu.pipeline_mode<synchronous>, transform_indices = @transform_1, window_bounds = array<i64: 3, 64, 128>}, {pipeline_mode = #tpu.pipeline_mode<synchronous>, transform_indices = @transform_2, window_bounds = array<i64: 32, 128>}, {pipeline_mode = #tpu.pipeline_mode<synchronous>, transform_indices = @transform_3, window_bounds = array<i64: 3, 128, 128>}, {pipeline_mode = #tpu.pipeline_mode<synchronous>, transform_indices = @transform_4, window_bounds = array<i64: 32, 128>}, {pipeline_mode = #tpu.pipeline_mode<synchronous>, transform_indices = @transform_5, window_bounds = array<i64: 64, 128>}, {pipeline_mode = #tpu.pipeline_mode<synchronous>, transform_indices = @transform_6, window_bounds = array<i64: 1, 128>}, {transform_indices = @transform_7, window_bounds = array<i64: 2, 16, 128>}]} {
    %cst = arith.constant 0.000000e+00 : f32
    %0 = vector.broadcast %cst : f32 to vector<2x1x64xf32>
    %c0 = arith.constant 0 : index
    %c0_0 = arith.constant 0 : index
    %c0_1 = arith.constant 0 : index
    %1 = vector.load %arg9[%c0, %c0_0, %c0_1] : memref<2x18x64xf32, #tpu.memory_space<vmem>>, vector<2x1x64xf32>
    tpu.vector_store %arg9[%c0, %c0_0, %c0_1], %0 {strides = array<i32>} : memref<2x18x64xf32, #tpu.memory_space<vmem>>, vector<2x1x64xf32>,
    %cst_2 = arith.constant 0.000000e+00 : f32
    %2 = vector.broadcast %cst_2 : f32 to vector<2x1x64xf32>
    %c0_3 = arith.constant 0 : index
    %c17 = arith.constant 17 : index
    %c0_4 = arith.constant 0 : index
    %3 = vector.load %arg9[%c0_3, %c17, %c0_4] : memref<2x18x64xf32, #tpu.memory_space<vmem>>, vector<2x1x64xf32>
    tpu.vector_store %arg9[%c0_3, %c17, %c0_4], %2 {strides = array<i32>} : memref<2x18x64xf32, #tpu.memory_space<vmem>>, vector<2x1x64xf32>,
    %cst_5 = arith.constant 0.000000e+00 : f32
    %4 = vector.broadcast %cst_5 : f32 to vector<2x1x128xf32>
    %c0_6 = arith.constant 0 : index
    %c0_7 = arith.constant 0 : index
    %c0_8 = arith.constant 0 : index
    %5 = vector.load %arg10[%c0_6, %c0_7, %c0_8] : memref<2x18x128xf32, #tpu.memory_space<vmem>>, vector<2x1x128xf32>
    tpu.vector_store %arg10[%c0_6, %c0_7, %c0_8], %4 {strides = array<i32>} : memref<2x18x128xf32, #tpu.memory_space<vmem>>, vector<2x1x128xf32>,
    %cst_9 = arith.constant 0.000000e+00 : f32
    %6 = vector.broadcast %cst_9 : f32 to vector<2x1x128xf32>
    %c0_10 = arith.constant 0 : index
    %c17_11 = arith.constant 17 : index
    %c0_12 = arith.constant 0 : index
    %7 = vector.load %arg10[%c0_10, %c17_11, %c0_12] : memref<2x18x128xf32, #tpu.memory_space<vmem>>, vector<2x1x128xf32>
    tpu.vector_store %arg10[%c0_10, %c17_11, %c0_12], %6 {strides = array<i32>} : memref<2x18x128xf32, #tpu.memory_space<vmem>>, vector<2x1x128xf32>,
    %c0_13 = arith.constant 0 : index
    %c0_14 = arith.constant 0 : index
    %c0_15 = arith.constant 0 : index
    %8 = vector.load %arg1[%c0_13, %c0_14, %c0_15] : memref<2x16x64xf32, #tpu.memory_space<vmem>>, vector<2x16x64xf32>
    %c0_16 = arith.constant 0 : index
    %c1 = arith.constant 1 : index
    %c0_17 = arith.constant 0 : index
    %9 = vector.load %arg9[%c0_16, %c1, %c0_17] : memref<2x18x64xf32, #tpu.memory_space<vmem>>, vector<2x16x64xf32>
    tpu.vector_store %arg9[%c0_16, %c1, %c0_17], %8 {strides = array<i32>} : memref<2x18x64xf32, #tpu.memory_space<vmem>>, vector<2x16x64xf32>,
    %c0_18 = arith.constant 0 : index
    %c0_19 = arith.constant 0 : index
    %10 = vector.load %arg3[%c0_18, %c0_19] : memref<32x128xf32, #tpu.memory_space<vmem>>, vector<32x128xf32>
    %c0_20 = arith.constant 0 : index
    %c0_21 = arith.constant 0 : index
    %c0_22 = arith.constant 0 : index
    %11 = vector.load %arg9[%c0_20, %c0_21, %c0_22] : memref<2x18x64xf32, #tpu.memory_space<vmem>>, vector<2x16x64xf32>
    %12 = vector.shape_cast %11 : vector<2x16x64xf32> to vector<32x64xf32>
    %c0_23 = arith.constant 0 : index
    %c0_24 = arith.constant 0 : index
    %c0_25 = arith.constant 0 : index
    %13 = vector.load %arg2[%c0_23, %c0_24, %c0_25] : memref<3x64x128xf32, #tpu.memory_space<vmem>>, vector<1x64x128xf32>
    %14 = vector.shape_cast %13 : vector<1x64x128xf32> to vector<64x128xf32>
    %cst_26 = arith.constant dense<0.000000e+00> : vector<32x128xf32>
    %15 = tpu.matmul %12, %14, %cst_26 {dimension_numbers = #tpu.dot_dimension_numbers<[1], [0], [0], [1], [0, 0, 1, 1], [], []>} : vector<32x64xf32>, vector<64x128xf32>, vector<32x128xf32> -> vector<32x128xf32>
    %16 = arith.addf %10, %15 : vector<32x128xf32>
    %c0_27 = arith.constant 0 : index
    %c1_28 = arith.constant 1 : index
    %c0_29 = arith.constant 0 : index
    %17 = vector.load %arg9[%c0_27, %c1_28, %c0_29] : memref<2x18x64xf32, #tpu.memory_space<vmem>>, vector<2x16x64xf32>
    %18 = vector.shape_cast %17 : vector<2x16x64xf32> to vector<32x64xf32>
    %c1_30 = arith.constant 1 : index
    %c0_31 = arith.constant 0 : index
    %c0_32 = arith.constant 0 : index
    %19 = vector.load %arg2[%c1_30, %c0_31, %c0_32] : memref<3x64x128xf32, #tpu.memory_space<vmem>>, vector<1x64x128xf32>
    %20 = vector.shape_cast %19 : vector<1x64x128xf32> to vector<64x128xf32>
    %cst_33 = arith.constant dense<0.000000e+00> : vector<32x128xf32>
    %21 = tpu.matmul %18, %20, %cst_33 {dimension_numbers = #tpu.dot_dimension_numbers<[1], [0], [0], [1], [0, 0, 1, 1], [], []>} : vector<32x64xf32>, vector<64x128xf32>, vector<32x128xf32> -> vector<32x128xf32>
    %22 = arith.addf %16, %21 : vector<32x128xf32>
    %c0_34 = arith.constant 0 : index
    %c2 = arith.constant 2 : index
    %c0_35 = arith.constant 0 : index
    %23 = vector.load %arg9[%c0_34, %c2, %c0_35] : memref<2x18x64xf32, #tpu.memory_space<vmem>>, vector<2x16x64xf32>
    %24 = vector.shape_cast %23 : vector<2x16x64xf32> to vector<32x64xf32>
    %c2_36 = arith.constant 2 : index
    %c0_37 = arith.constant 0 : index
    %c0_38 = arith.constant 0 : index
    %25 = vector.load %arg2[%c2_36, %c0_37, %c0_38] : memref<3x64x128xf32, #tpu.memory_space<vmem>>, vector<1x64x128xf32>
    %26 = vector.shape_cast %25 : vector<1x64x128xf32> to vector<64x128xf32>
    %cst_39 = arith.constant dense<0.000000e+00> : vector<32x128xf32>
    %27 = tpu.matmul %24, %26, %cst_39 {dimension_numbers = #tpu.dot_dimension_numbers<[1], [0], [0], [1], [0, 0, 1, 1], [], []>} : vector<32x64xf32>, vector<64x128xf32>, vector<32x128xf32> -> vector<32x128xf32>
    %28 = arith.addf %22, %27 : vector<32x128xf32>
    %cst_40 = arith.constant 0.000000e+00 : f32
    %29 = vector.broadcast %cst_40 : f32 to vector<32x128xf32>
    %30 = arith.cmpf oge, %28, %29 : vector<32x128xf32>
    %cst_41 = arith.constant 2.000000e-01 : f32
    %31 = vector.broadcast %cst_41 : f32 to vector<32x128xf32>
    %32 = arith.mulf %31, %28 : vector<32x128xf32>
    %33 = arith.select %30, %28, %32 : vector<32x128xi1>, vector<32x128xf32>
    %34 = vector.shape_cast %33 : vector<32x128xf32> to vector<2x16x128xf32>
    %c0_42 = arith.constant 0 : index
    %c1_43 = arith.constant 1 : index
    %c0_44 = arith.constant 0 : index
    %35 = vector.load %arg10[%c0_42, %c1_43, %c0_44] : memref<2x18x128xf32, #tpu.memory_space<vmem>>, vector<2x16x128xf32>
    tpu.vector_store %arg10[%c0_42, %c1_43, %c0_44], %34 {strides = array<i32>} : memref<2x18x128xf32, #tpu.memory_space<vmem>>, vector<2x16x128xf32>,
    %c0_45 = arith.constant 0 : index
    %c0_46 = arith.constant 0 : index
    %36 = vector.load %arg5[%c0_45, %c0_46] : memref<32x128xf32, #tpu.memory_space<vmem>>, vector<32x128xf32>
    %c0_47 = arith.constant 0 : index
    %c0_48 = arith.constant 0 : index
    %c0_49 = arith.constant 0 : index
    %37 = vector.load %arg10[%c0_47, %c0_48, %c0_49] : memref<2x18x128xf32, #tpu.memory_space<vmem>>, vector<2x16x128xf32>
    %38 = vector.shape_cast %37 : vector<2x16x128xf32> to vector<32x128xf32>
    %c0_50 = arith.constant 0 : index
    %c0_51 = arith.constant 0 : index
    %c0_52 = arith.constant 0 : index
    %39 = vector.load %arg4[%c0_50, %c0_51, %c0_52] : memref<3x128x128xf32, #tpu.memory_space<vmem>>, vector<1x128x128xf32>
    %40 = vector.shape_cast %39 : vector<1x128x128xf32> to vector<128x128xf32>
    %cst_53 = arith.constant dense<0.000000e+00> : vector<32x128xf32>
    %41 = tpu.matmul %38, %40, %cst_53 {dimension_numbers = #tpu.dot_dimension_numbers<[1], [0], [0], [1], [0, 0, 1, 1], [], []>} : vector<32x128xf32>, vector<128x128xf32>, vector<32x128xf32> -> vector<32x128xf32>
    %42 = arith.addf %36, %41 : vector<32x128xf32>
    %c0_54 = arith.constant 0 : index
    %c1_55 = arith.constant 1 : index
    %c0_56 = arith.constant 0 : index
    %43 = vector.load %arg10[%c0_54, %c1_55, %c0_56] : memref<2x18x128xf32, #tpu.memory_space<vmem>>, vector<2x16x128xf32>
    %44 = vector.shape_cast %43 : vector<2x16x128xf32> to vector<32x128xf32>
    %c1_57 = arith.constant 1 : index
    %c0_58 = arith.constant 0 : index
    %c0_59 = arith.constant 0 : index
    %45 = vector.load %arg4[%c1_57, %c0_58, %c0_59] : memref<3x128x128xf32, #tpu.memory_space<vmem>>, vector<1x128x128xf32>
    %46 = vector.shape_cast %45 : vector<1x128x128xf32> to vector<128x128xf32>
    %cst_60 = arith.constant dense<0.000000e+00> : vector<32x128xf32>
    %47 = tpu.matmul %44, %46, %cst_60 {dimension_numbers = #tpu.dot_dimension_numbers<[1], [0], [0], [1], [0, 0, 1, 1], [], []>} : vector<32x128xf32>, vector<128x128xf32>, vector<32x128xf32> -> vector<32x128xf32>
    %48 = arith.addf %42, %47 : vector<32x128xf32>
    %c0_61 = arith.constant 0 : index
    %c2_62 = arith.constant 2 : index
    %c0_63 = arith.constant 0 : index
    %49 = vector.load %arg10[%c0_61, %c2_62, %c0_63] : memref<2x18x128xf32, #tpu.memory_space<vmem>>, vector<2x16x128xf32>
    %50 = vector.shape_cast %49 : vector<2x16x128xf32> to vector<32x128xf32>
    %c2_64 = arith.constant 2 : index
    %c0_65 = arith.constant 0 : index
    %c0_66 = arith.constant 0 : index
    %51 = vector.load %arg4[%c2_64, %c0_65, %c0_66] : memref<3x128x128xf32, #tpu.memory_space<vmem>>, vector<1x128x128xf32>
    %52 = vector.shape_cast %51 : vector<1x128x128xf32> to vector<128x128xf32>
    %cst_67 = arith.constant dense<0.000000e+00> : vector<32x128xf32>
    %53 = tpu.matmul %50, %52, %cst_67 {dimension_numbers = #tpu.dot_dimension_numbers<[1], [0], [0], [1], [0, 0, 1, 1], [], []>} : vector<32x128xf32>, vector<128x128xf32>, vector<32x128xf32> -> vector<32x128xf32>
    %54 = arith.addf %48, %53 : vector<32x128xf32>
    %cst_68 = arith.constant 0.000000e+00 : f32
    %55 = vector.broadcast %cst_68 : f32 to vector<32x128xf32>
    %56 = arith.cmpf oge, %54, %55 : vector<32x128xf32>
    %cst_69 = arith.constant 2.000000e-01 : f32
    %57 = vector.broadcast %cst_69 : f32 to vector<32x128xf32>
    %58 = arith.mulf %57, %54 : vector<32x128xf32>
    %59 = arith.select %56, %54, %58 : vector<32x128xi1>, vector<32x128xf32>
    %60 = vector.shape_cast %8 : vector<2x16x64xf32> to vector<32x64xf32>
    %c0_70 = arith.constant 0 : index
    %c0_71 = arith.constant 0 : index
    %61 = vector.load %arg6[%c0_70, %c0_71] : memref<64x128xf32, #tpu.memory_space<vmem>>, vector<64x128xf32>
    %cst_72 = arith.constant dense<0.000000e+00> : vector<32x128xf32>
    %62 = tpu.matmul %60, %61, %cst_72 {dimension_numbers = #tpu.dot_dimension_numbers<[1], [0], [0], [1], [0, 0, 1, 1], [], []>} : vector<32x64xf32>, vector<64x128xf32>, vector<32x128xf32> -> vector<32x128xf32>
    %c0_73 = arith.constant 0 : index
    %c0_74 = arith.constant 0 : index
    %63 = vector.load %arg7[%c0_73, %c0_74] : memref<1x128xf32, #tpu.memory_space<vmem>>, vector<1x128xf32>
    %64 = vector.broadcast %63 : vector<1x128xf32> to vector<32x128xf32>
    %65 = arith.addf %62, %64 : vector<32x128xf32>
    %66 = arith.addf %59, %65 : vector<32x128xf32>
    %cst_75 = arith.constant 0.707106769 : f32
    %67 = vector.broadcast %cst_75 : f32 to vector<32x128xf32>
    %68 = arith.mulf %66, %67 : vector<32x128xf32>
    %69 = vector.shape_cast %68 : vector<32x128xf32> to vector<2x16x128xf32>
    %c0_76 = arith.constant 0 : index
    %c0_77 = arith.constant 0 : index
    %c0_78 = arith.constant 0 : index
    %70 = vector.load %arg8[%c0_76, %c0_77, %c0_78] : memref<2x16x128xf32, #tpu.memory_space<vmem>>, vector<2x16x128xf32>
    tpu.vector_store %arg8[%c0_76, %c0_77, %c0_78], %69 {strides = array<i32>} : memref<2x16x128xf32, #tpu.memory_space<vmem>>, vector<2x16x128xf32>,
    return
  }
  func.func @transform_0(%arg0: i32) -> (i32, i32, i32) {
    %c0_i32 = arith.constant 0 : i32
    %c0_i32_0 = arith.constant 0 : i32
    %c0_i32_1 = arith.constant 0 : i32
    return %arg0, %c0_i32, %c0_i32_0 : i32, i32, i32
  }
  func.func @transform_1(%arg0: i32) -> (i32, i32, i32) {
    %c0_i32 = arith.constant 0 : i32
    %c0_i32_0 = arith.constant 0 : i32
    %c0_i32_1 = arith.constant 0 : i32
    %c0_i32_2 = arith.constant 0 : i32
    return %c0_i32, %c0_i32_0, %c0_i32_1 : i32, i32, i32
  }
  func.func @transform_2(%arg0: i32) -> (i32, i32) {
    %c0_i32 = arith.constant 0 : i32
    %c0_i32_0 = arith.constant 0 : i32
    %c0_i32_1 = arith.constant 0 : i32
    return %c0_i32, %c0_i32_0 : i32, i32
  }
  func.func @transform_3(%arg0: i32) -> (i32, i32, i32) {
    %c0_i32 = arith.constant 0 : i32
    %c0_i32_0 = arith.constant 0 : i32
    %c0_i32_1 = arith.constant 0 : i32
    %c0_i32_2 = arith.constant 0 : i32
    return %c0_i32, %c0_i32_0, %c0_i32_1 : i32, i32, i32
  }
  func.func @transform_4(%arg0: i32) -> (i32, i32) {
    %c0_i32 = arith.constant 0 : i32
    %c0_i32_0 = arith.constant 0 : i32
    %c0_i32_1 = arith.constant 0 : i32
    return %c0_i32, %c0_i32_0 : i32, i32
  }
  func.func @transform_5(%arg0: i32) -> (i32, i32) {
    %c0_i32 = arith.constant 0 : i32
    %c0_i32_0 = arith.constant 0 : i32
    %c0_i32_1 = arith.constant 0 : i32
    return %c0_i32, %c0_i32_0 : i32, i32
  }
  func.func @transform_6(%arg0: i32) -> (i32, i32) {
    %c0_i32 = arith.constant 0 : i32
    %c0_i32_0 = arith.constant 0 : i32
    %c0_i32_1 = arith.constant 0 : i32
    return %c0_i32, %c0_i32_0 : i32, i32
  }
  func.func @transform_7(%arg0: i32) -> (i32, i32, i32) {
    %c0_i32 = arith.constant 0 : i32
    %c0_i32_0 = arith.constant 0 : i32
    %c0_i32_1 = arith.constant 0 : i32
    return %arg0, %c0_i32, %c0_i32_0 : i32, i32, i32
  }
}

module attributes {stable_mosaic.version = 11 : i64} {
  func.func @_fused_block_kernel(%arg0: i32, %arg1: memref<2x16x64xf32, #tpu.memory_space<vmem>>, %arg2: memref<3x64x128xf32, #tpu.memory_space<vmem>>, %arg3: memref<32x128xf32, #tpu.memory_space<vmem>>, %arg4: memref<3x128x128xf32, #tpu.memory_space<vmem>>, %arg5: memref<32x128xf32, #tpu.memory_space<vmem>>, %arg6: memref<64x128xf32, #tpu.memory_space<vmem>>, %arg7: memref<1x128xf32, #tpu.memory_space<vmem>>, %arg8: memref<2x16x128xf32, #tpu.memory_space<vmem>>, %arg9: memref<2x18x64xf32, #tpu.memory_space<vmem>>, %arg10: memref<2x18x128xf32, #tpu.memory_space<vmem>>) attributes {dimension_semantics = [#tpu.dimension_semantics<parallel>], iteration_bounds = array<i64: 1>, scalar_prefetch = 0 : i64, scratch_operands = 2 : i64, tpu.core_type = #tpu.core_type<tc>, window_params = [{transform_indices = @transform_0, window_bounds = array<i64: 2, 16, 64>}, {pipeline_mode = #tpu.pipeline_mode<synchronous>, transform_indices = @transform_1, window_bounds = array<i64: 3, 64, 128>}, {pipeline_mode = #tpu.pipeline_mode<synchronous>, transform_indices = @transform_2, window_bounds = array<i64: 32, 128>}, {pipeline_mode = #tpu.pipeline_mode<synchronous>, transform_indices = @transform_3, window_bounds = array<i64: 3, 128, 128>}, {pipeline_mode = #tpu.pipeline_mode<synchronous>, transform_indices = @transform_4, window_bounds = array<i64: 32, 128>}, {pipeline_mode = #tpu.pipeline_mode<synchronous>, transform_indices = @transform_5, window_bounds = array<i64: 64, 128>}, {pipeline_mode = #tpu.pipeline_mode<synchronous>, transform_indices = @transform_6, window_bounds = array<i64: 1, 128>}, {transform_indices = @transform_7, window_bounds = array<i64: 2, 16, 128>}]} {
    %cst = arith.constant 0.000000e+00 : f32
    %0 = vector.broadcast %cst : f32 to vector<2x1x64xf32>
    %c0 = arith.constant 0 : index
    %c0_0 = arith.constant 0 : index
    %c0_1 = arith.constant 0 : index
    %1 = vector.load %arg9[%c0, %c0_0, %c0_1] : memref<2x18x64xf32, #tpu.memory_space<vmem>>, vector<2x1x64xf32>
    tpu.vector_store %arg9[%c0, %c0_0, %c0_1], %0 {strides = array<i32>} : memref<2x18x64xf32, #tpu.memory_space<vmem>>, vector<2x1x64xf32>,
    %cst_2 = arith.constant 0.000000e+00 : f32
    %2 = vector.broadcast %cst_2 : f32 to vector<2x1x64xf32>
    %c0_3 = arith.constant 0 : index
    %c17 = arith.constant 17 : index
    %c0_4 = arith.constant 0 : index
    %3 = vector.load %arg9[%c0_3, %c17, %c0_4] : memref<2x18x64xf32, #tpu.memory_space<vmem>>, vector<2x1x64xf32>
    tpu.vector_store %arg9[%c0_3, %c17, %c0_4], %2 {strides = array<i32>} : memref<2x18x64xf32, #tpu.memory_space<vmem>>, vector<2x1x64xf32>,
    %cst_5 = arith.constant 0.000000e+00 : f32
    %4 = vector.broadcast %cst_5 : f32 to vector<2x1x128xf32>
    %c0_6 = arith.constant 0 : index
    %c0_7 = arith.constant 0 : index
    %c0_8 = arith.constant 0 : index
    %5 = vector.load %arg10[%c0_6, %c0_7, %c0_8] : memref<2x18x128xf32, #tpu.memory_space<vmem>>, vector<2x1x128xf32>
    tpu.vector_store %arg10[%c0_6, %c0_7, %c0_8], %4 {strides = array<i32>} : memref<2x18x128xf32, #tpu.memory_space<vmem>>, vector<2x1x128xf32>,
    %cst_9 = arith.constant 0.000000e+00 : f32
    %6 = vector.broadcast %cst_9 : f32 to vector<2x1x128xf32>
    %c0_10 = arith.constant 0 : index
    %c17_11 = arith.constant 17 : index
    %c0_12 = arith.constant 0 : index
    %7 = vector.load %arg10[%c0_10, %c17_11, %c0_12] : memref<2x18x128xf32, #tpu.memory_space<vmem>>, vector<2x1x128xf32>
    tpu.vector_store %arg10[%c0_10, %c17_11, %c0_12], %6 {strides = array<i32>} : memref<2x18x128xf32, #tpu.memory_space<vmem>>, vector<2x1x128xf32>,
    %c0_13 = arith.constant 0 : index
    %c0_14 = arith.constant 0 : index
    %c0_15 = arith.constant 0 : index
    %8 = vector.load %arg1[%c0_13, %c0_14, %c0_15] : memref<2x16x64xf32, #tpu.memory_space<vmem>>, vector<2x16x64xf32>
    %c0_16 = arith.constant 0 : index
    %c1 = arith.constant 1 : index
    %c0_17 = arith.constant 0 : index
    %9 = vector.load %arg9[%c0_16, %c1, %c0_17] : memref<2x18x64xf32, #tpu.memory_space<vmem>>, vector<2x16x64xf32>
    tpu.vector_store %arg9[%c0_16, %c1, %c0_17], %8 {strides = array<i32>} : memref<2x18x64xf32, #tpu.memory_space<vmem>>, vector<2x16x64xf32>,
    %c0_18 = arith.constant 0 : index
    %c0_19 = arith.constant 0 : index
    %10 = vector.load %arg3[%c0_18, %c0_19] : memref<32x128xf32, #tpu.memory_space<vmem>>, vector<32x128xf32>
    %c0_20 = arith.constant 0 : index
    %c0_21 = arith.constant 0 : index
    %c0_22 = arith.constant 0 : index
    %11 = vector.load %arg9[%c0_20, %c0_21, %c0_22] : memref<2x18x64xf32, #tpu.memory_space<vmem>>, vector<2x16x64xf32>
    %12 = vector.shape_cast %11 : vector<2x16x64xf32> to vector<32x64xf32>
    %c0_23 = arith.constant 0 : index
    %c0_24 = arith.constant 0 : index
    %c0_25 = arith.constant 0 : index
    %13 = vector.load %arg2[%c0_23, %c0_24, %c0_25] : memref<3x64x128xf32, #tpu.memory_space<vmem>>, vector<1x64x128xf32>
    %14 = vector.shape_cast %13 : vector<1x64x128xf32> to vector<64x128xf32>
    %cst_26 = arith.constant dense<0.000000e+00> : vector<32x128xf32>
    %15 = tpu.matmul %12, %14, %cst_26 {dimension_numbers = #tpu.dot_dimension_numbers<[1], [0], [0], [1], [0, 0, 1, 1], [], []>} : vector<32x64xf32>, vector<64x128xf32>, vector<32x128xf32> -> vector<32x128xf32>
    %16 = arith.addf %10, %15 : vector<32x128xf32>
    %c0_27 = arith.constant 0 : index
    %c1_28 = arith.constant 1 : index
    %c0_29 = arith.constant 0 : index
    %17 = vector.load %arg9[%c0_27, %c1_28, %c0_29] : memref<2x18x64xf32, #tpu.memory_space<vmem>>, vector<2x16x64xf32>
    %18 = vector.shape_cast %17 : vector<2x16x64xf32> to vector<32x64xf32>
    %c1_30 = arith.constant 1 : index
    %c0_31 = arith.constant 0 : index
    %c0_32 = arith.constant 0 : index
    %19 = vector.load %arg2[%c1_30, %c0_31, %c0_32] : memref<3x64x128xf32, #tpu.memory_space<vmem>>, vector<1x64x128xf32>
    %20 = vector.shape_cast %19 : vector<1x64x128xf32> to vector<64x128xf32>
    %cst_33 = arith.constant dense<0.000000e+00> : vector<32x128xf32>
    %21 = tpu.matmul %18, %20, %cst_33 {dimension_numbers = #tpu.dot_dimension_numbers<[1], [0], [0], [1], [0, 0, 1, 1], [], []>} : vector<32x64xf32>, vector<64x128xf32>, vector<32x128xf32> -> vector<32x128xf32>
    %22 = arith.addf %16, %21 : vector<32x128xf32>
    %c0_34 = arith.constant 0 : index
    %c2 = arith.constant 2 : index
    %c0_35 = arith.constant 0 : index
    %23 = vector.load %arg9[%c0_34, %c2, %c0_35] : memref<2x18x64xf32, #tpu.memory_space<vmem>>, vector<2x16x64xf32>
    %24 = vector.shape_cast %23 : vector<2x16x64xf32> to vector<32x64xf32>
    %c2_36 = arith.constant 2 : index
    %c0_37 = arith.constant 0 : index
    %c0_38 = arith.constant 0 : index
    %25 = vector.load %arg2[%c2_36, %c0_37, %c0_38] : memref<3x64x128xf32, #tpu.memory_space<vmem>>, vector<1x64x128xf32>
    %26 = vector.shape_cast %25 : vector<1x64x128xf32> to vector<64x128xf32>
    %cst_39 = arith.constant dense<0.000000e+00> : vector<32x128xf32>
    %27 = tpu.matmul %24, %26, %cst_39 {dimension_numbers = #tpu.dot_dimension_numbers<[1], [0], [0], [1], [0, 0, 1, 1], [], []>} : vector<32x64xf32>, vector<64x128xf32>, vector<32x128xf32> -> vector<32x128xf32>
    %28 = arith.addf %22, %27 : vector<32x128xf32>
    %cst_40 = arith.constant 0.000000e+00 : f32
    %29 = vector.broadcast %cst_40 : f32 to vector<32x128xf32>
    %30 = arith.cmpf oge, %28, %29 : vector<32x128xf32>
    %cst_41 = arith.constant 2.000000e-01 : f32
    %31 = vector.broadcast %cst_41 : f32 to vector<32x128xf32>
    %32 = arith.mulf %31, %28 : vector<32x128xf32>
    %33 = arith.select %30, %28, %32 : vector<32x128xi1>, vector<32x128xf32>
    %34 = vector.shape_cast %33 : vector<32x128xf32> to vector<2x16x128xf32>
    %c0_42 = arith.constant 0 : index
    %c1_43 = arith.constant 1 : index
    %c0_44 = arith.constant 0 : index
    %35 = vector.load %arg10[%c0_42, %c1_43, %c0_44] : memref<2x18x128xf32, #tpu.memory_space<vmem>>, vector<2x16x128xf32>
    tpu.vector_store %arg10[%c0_42, %c1_43, %c0_44], %34 {strides = array<i32>} : memref<2x18x128xf32, #tpu.memory_space<vmem>>, vector<2x16x128xf32>,
    %c0_45 = arith.constant 0 : index
    %c0_46 = arith.constant 0 : index
    %36 = vector.load %arg5[%c0_45, %c0_46] : memref<32x128xf32, #tpu.memory_space<vmem>>, vector<32x128xf32>
    %c0_47 = arith.constant 0 : index
    %c0_48 = arith.constant 0 : index
    %c0_49 = arith.constant 0 : index
    %37 = vector.load %arg10[%c0_47, %c0_48, %c0_49] : memref<2x18x128xf32, #tpu.memory_space<vmem>>, vector<2x16x128xf32>
    %38 = vector.shape_cast %37 : vector<2x16x128xf32> to vector<32x128xf32>
    %c0_50 = arith.constant 0 : index
    %c0_51 = arith.constant 0 : index
    %c0_52 = arith.constant 0 : index
    %39 = vector.load %arg4[%c0_50, %c0_51, %c0_52] : memref<3x128x128xf32, #tpu.memory_space<vmem>>, vector<1x128x128xf32>
    %40 = vector.shape_cast %39 : vector<1x128x128xf32> to vector<128x128xf32>
    %cst_53 = arith.constant dense<0.000000e+00> : vector<32x128xf32>
    %41 = tpu.matmul %38, %40, %cst_53 {dimension_numbers = #tpu.dot_dimension_numbers<[1], [0], [0], [1], [0, 0, 1, 1], [], []>} : vector<32x128xf32>, vector<128x128xf32>, vector<32x128xf32> -> vector<32x128xf32>
    %42 = arith.addf %36, %41 : vector<32x128xf32>
    %c0_54 = arith.constant 0 : index
    %c1_55 = arith.constant 1 : index
    %c0_56 = arith.constant 0 : index
    %43 = vector.load %arg10[%c0_54, %c1_55, %c0_56] : memref<2x18x128xf32, #tpu.memory_space<vmem>>, vector<2x16x128xf32>
    %44 = vector.shape_cast %43 : vector<2x16x128xf32> to vector<32x128xf32>
    %c1_57 = arith.constant 1 : index
    %c0_58 = arith.constant 0 : index
    %c0_59 = arith.constant 0 : index
    %45 = vector.load %arg4[%c1_57, %c0_58, %c0_59] : memref<3x128x128xf32, #tpu.memory_space<vmem>>, vector<1x128x128xf32>
    %46 = vector.shape_cast %45 : vector<1x128x128xf32> to vector<128x128xf32>
    %cst_60 = arith.constant dense<0.000000e+00> : vector<32x128xf32>
    %47 = tpu.matmul %44, %46, %cst_60 {dimension_numbers = #tpu.dot_dimension_numbers<[1], [0], [0], [1], [0, 0, 1, 1], [], []>} : vector<32x128xf32>, vector<128x128xf32>, vector<32x128xf32> -> vector<32x128xf32>
    %48 = arith.addf %42, %47 : vector<32x128xf32>
    %c0_61 = arith.constant 0 : index
    %c2_62 = arith.constant 2 : index
    %c0_63 = arith.constant 0 : index
    %49 = vector.load %arg10[%c0_61, %c2_62, %c0_63] : memref<2x18x128xf32, #tpu.memory_space<vmem>>, vector<2x16x128xf32>
    %50 = vector.shape_cast %49 : vector<2x16x128xf32> to vector<32x128xf32>
    %c2_64 = arith.constant 2 : index
    %c0_65 = arith.constant 0 : index
    %c0_66 = arith.constant 0 : index
    %51 = vector.load %arg4[%c2_64, %c0_65, %c0_66] : memref<3x128x128xf32, #tpu.memory_space<vmem>>, vector<1x128x128xf32>
    %52 = vector.shape_cast %51 : vector<1x128x128xf32> to vector<128x128xf32>
    %cst_67 = arith.constant dense<0.000000e+00> : vector<32x128xf32>
    %53 = tpu.matmul %50, %52, %cst_67 {dimension_numbers = #tpu.dot_dimension_numbers<[1], [0], [0], [1], [0, 0, 1, 1], [], []>} : vector<32x128xf32>, vector<128x128xf32>, vector<32x128xf32> -> vector<32x128xf32>
    %54 = arith.addf %48, %53 : vector<32x128xf32>
    %cst_68 = arith.constant 0.000000e+00 : f32
    %55 = vector.broadcast %cst_68 : f32 to vector<32x128xf32>
    %56 = arith.cmpf oge, %54, %55 : vector<32x128xf32>
    %cst_69 = arith.constant 2.000000e-01 : f32
    %57 = vector.broadcast %cst_69 : f32 to vector<32x128xf32>
    %58 = arith.mulf %57, %54 : vector<32x128xf32>
    %59 = arith.select %56, %54, %58 : vector<32x128xi1>, vector<32x128xf32>
    %60 = vector.shape_cast %8 : vector<2x16x64xf32> to vector<32x64xf32>
    %c0_70 = arith.constant 0 : index
    %c0_71 = arith.constant 0 : index
    %61 = vector.load %arg6[%c0_70, %c0_71] : memref<64x128xf32, #tpu.memory_space<vmem>>, vector<64x128xf32>
    %cst_72 = arith.constant dense<0.000000e+00> : vector<32x128xf32>
    %62 = tpu.matmul %60, %61, %cst_72 {dimension_numbers = #tpu.dot_dimension_numbers<[1], [0], [0], [1], [0, 0, 1, 1], [], []>} : vector<32x64xf32>, vector<64x128xf32>, vector<32x128xf32> -> vector<32x128xf32>
    %c0_73 = arith.constant 0 : index
    %c0_74 = arith.constant 0 : index
    %63 = vector.load %arg7[%c0_73, %c0_74] : memref<1x128xf32, #tpu.memory_space<vmem>>, vector<1x128xf32>
    %64 = vector.broadcast %63 : vector<1x128xf32> to vector<32x128xf32>
    %65 = arith.addf %62, %64 : vector<32x128xf32>
    %66 = arith.addf %59, %65 : vector<32x128xf32>
    %cst_75 = arith.constant 0.707106769 : f32
    %67 = vector.broadcast %cst_75 : f32 to vector<32x128xf32>
    %68 = arith.mulf %66, %67 : vector<32x128xf32>
    %69 = vector.shape_cast %68 : vector<32x128xf32> to vector<2x16x128xf32>
    %c0_76 = arith.constant 0 : index
    %c0_77 = arith.constant 0 : index
    %c0_78 = arith.constant 0 : index
    %70 = vector.load %arg8[%c0_76, %c0_77, %c0_78] : memref<2x16x128xf32, #tpu.memory_space<vmem>>, vector<2x16x128xf32>
    tpu.vector_store %arg8[%c0_76, %c0_77, %c0_78], %69 {strides = array<i32>} : memref<2x16x128xf32, #tpu.memory_space<vmem>>, vector<2x16x128xf32>,
    return
  }
  func.func @transform_0(%arg0: i32) -> (i32, i32, i32) {
    %c0_i32 = arith.constant 0 : i32
    %c0_i32_0 = arith.constant 0 : i32
    %c0_i32_1 = arith.constant 0 : i32
    return %arg0, %c0_i32, %c0_i32_0 : i32, i32, i32
  }
  func.func @transform_1(%arg0: i32) -> (i32, i32, i32) {
    %c0_i32 = arith.constant 0 : i32
    %c0_i32_0 = arith.constant 0 : i32
    %c0_i32_1 = arith.constant 0 : i32
    %c0_i32_2 = arith.constant 0 : i32
    return %c0_i32, %c0_i32_0, %c0_i32_1 : i32, i32, i32
  }
  func.func @transform_2(%arg0: i32) -> (i32, i32) {
    %c0_i32 = arith.constant 0 : i32
    %c0_i32_0 = arith.constant 0 : i32
    %c0_i32_1 = arith.constant 0 : i32
    return %c0_i32, %c0_i32_0 : i32, i32
  }
  func.func @transform_3(%arg0: i32) -> (i32, i32, i32) {
    %c0_i32 = arith.constant 0 : i32
    %c0_i32_0 = arith.constant 0 : i32
    %c0_i32_1 = arith.constant 0 : i32
    %c0_i32_2 = arith.constant 0 : i32
    return %c0_i32, %c0_i32_0, %c0_i32_1 : i32, i32, i32
  }
  func.func @transform_4(%arg0: i32) -> (i32, i32) {
    %c0_i32 = arith.constant 0 : i32
    %c0_i32_0 = arith.constant 0 : i32
    %c0_i32_1 = arith.constant 0 : i32
    return %c0_i32, %c0_i32_0 : i32, i32
  }
  func.func @transform_5(%arg0: i32) -> (i32, i32) {
    %c0_i32 = arith.constant 0 : i32
    %c0_i32_0 = arith.constant 0 : i32
    %c0_i32_1 = arith.constant 0 : i32
    return %c0_i32, %c0_i32_0 : i32, i32
  }
  func.func @transform_6(%arg0: i32) -> (i32, i32) {
    %c0_i32 = arith.constant 0 : i32
    %c0_i32_0 = arith.constant 0 : i32
    %c0_i32_1 = arith.constant 0 : i32
    return %c0_i32, %c0_i32_0 : i32, i32
  }
  func.func @transform_7(%arg0: i32) -> (i32, i32, i32) {
    %c0_i32 = arith.constant 0 : i32
    %c0_i32_0 = arith.constant 0 : i32
    %c0_i32_1 = arith.constant 0 : i32
    return %arg0, %c0_i32, %c0_i32_0 : i32, i32, i32
  }
}

</mosaic_0001>

<bundles_post_ra>
// kernel: tpu_custom_call.1
= control target key start
LH: loop header
LB: loop body
LE: loop exit
PB: predicated region body
PF: predicated region fallthrough
CT: control target
= control target key end

     0   :  { %12 = vsyncpa [#allocation5], 0  ;;  %s1885_s0 = inlined_call_operand.hbm [shape: f32[2,16,64], index: 0, kind: input, shape index: {}]   ;;  %s1886_s1 = inlined_call_operand.hbm [shape: f32[3,64,128], index: 1, kind: input, shape index: {}]   ;;  %s1887_s2 = inlined_call_operand.hbm [shape: f32[32,128], index: 2, kind: input, shape index: {}]   ;;  %s1888_s3 = inlined_call_operand.hbm [shape: f32[3,128,128], index: 3, kind: input, shape index: {}]   ;;  %s1889_s4 = inlined_call_operand.hbm [shape: f32[32,128], index: 4, kind: input, shape index: {}]   ;;  %s1890_s5 = inlined_call_operand.hbm [shape: f32[64,128], index: 5, kind: input, shape index: {}]   ;;  %s1891_s6 = inlined_call_operand.vmem [shape: f32[1,128], index: 6, kind: input, shape index: {}]   ;;  %s1892_s7 = inlined_call_operand.hbm [shape: f32[2,16,128], index: 7, kind: output, shape index: {}]  }
   0x1   :  { %13 = vsyncpa [#allocation8], 0 }
   0x2   :  { %14 = vsyncpa [#allocation11], 0 }
   0x3   :  { %15 = vsyncpa [#allocation14], 0 }
   0x4   :  { %16 = vsyncpa [#allocation6], 0  ;;  %s1662_s24 = smov [#allocation7]   ;;  %s1663_s26 = smov [#allocation10]  }
   0x5   :  { %s34_s25 = sshll.u32 %s1662_s24, 4  ;;  %s58_s27 = sshll.u32 %s1663_s26, 4  ;;  %s35_s25 = int_to_ptr.vmem [resolvable:$true] %s34_s25  ;;  %s1712_s27 = int_to_ptr.vmem [resolvable:$true] %s58_s27 }
   0x6   :  { %s1498_s30 = scalar_lea.hbm %s1886_s1, 3072 }
   0x7   :  { %p1499_p0 = scmp.ne.s32.totalorder %s1886_s1, %s1498_s30  ;;  %p1502_p1 = scmp.lt.u32.totalorder %s1498_s30, %s1886_s1 }
   0x9   :  { %p1504_p2 = pnand %p1502_p1, %p1499_p0 }
   0xb   :  { %1507 = shalt.err (!%p1504_p2)
}
   0xc   :  { %s1508_s12 = scalar_lea.vmem %s35_s25, 3072  ;;  %p1513_p4 = scmp.lt.s32.totalorder %s35_s25, %s35_s25 }
   0xd   :  { %p1509_p3 = scmp.ne.s32.totalorder %s35_s25, %s1508_s12  ;;  %p1514_p5 = scmp.lt.s32.totalorder %s1508_s12, %s1508_s12 }
   0xf   :  { %p1515_p6 = por %p1514_p5, %p1513_p4 }
  0x11   :  { %p1516_p7 = pnand %p1515_p6, %p1509_p3 }
  0x13   :  { %1519 = shalt.err (!%p1516_p7)
}
  0x14   :  { %s1664_s13 = smov 128   ;;  %s1665_s14 = smov 8  }
  0x15   :  { %40 = dma.hbm_to_vmem [thread:$0]  %s1886_s1, 3072, %s35_s25, [#allocation8], %s1664_s13, %s1664_s13, %s1665_s14  }
  0x16   :  { %s1520_s19 = scalar_lea.hbm %s1888_s3, 6144 }
  0x17   :  { %p1521_p8 = scmp.ne.s32.totalorder %s1888_s3, %s1520_s19  ;;  %p1524_p9 = scmp.lt.u32.totalorder %s1520_s19, %s1888_s3 }
  0x19   :  { %p1526_p10 = pnand %p1524_p9, %p1521_p8 }
  0x1b   :  { %1529 = shalt.err (!%p1526_p10)
}
  0x1c   :  { %s1530_s24 = scalar_lea.vmem %s1712_s27, 6144  ;;  %p1535_p12 = scmp.lt.s32.totalorder %s1712_s27, %s1712_s27 }
  0x1d   :  { %p1531_p11 = scmp.ne.s32.totalorder %s1712_s27, %s1530_s24  ;;  %p1536_p13 = scmp.lt.s32.totalorder %s1530_s24, %s1530_s24 }
  0x1f   :  { %p1537_p0 = por %p1536_p13, %p1535_p12 }
  0x21   :  { %p1538_p1 = pnand %p1537_p0, %p1531_p11 }
  0x23   :  { %1541 = shalt.err (!%p1538_p1)
}
  0x24   :  { %64 = dma.hbm_to_vmem [thread:$0]  %s1888_s3, 6144, %s1712_s27, [#allocation11], %s1664_s13, %s1664_s13, %s1665_s14  }
  0x25   :  { %s1666_s26 = smov [#allocation4]   ;;  %s1667_s29 = smov [#allocation9]  }
  0x26   :  { %s22_s28 = sshll.u32 %s1666_s26, 4  ;;  %s46_s30 = sshll.u32 %s1667_s29, 4  ;;  %s23_s28 = int_to_ptr.vmem [resolvable:$true] %s22_s28  ;;  %s1749_s30 = int_to_ptr.vmem [resolvable:$true] %s46_s30 }
  0x27   :  { %s1542_s10 = scalar_lea.hbm %s1885_s0, 512 }
  0x28   :  { %p1543_p2 = scmp.ne.s32.totalorder %s1885_s0, %s1542_s10  ;;  %p1546_p3 = scmp.lt.u32.totalorder %s1542_s10, %s1885_s0 }
  0x2a   :  { %p1548_p4 = pnand %p1546_p3, %p1543_p2 }
  0x2c   :  { %1551 = shalt.err (!%p1548_p4)
}
  0x2d   :  { %s1552_s3 = scalar_lea.vmem %s23_s28, 512  ;;  %p1557_p6 = scmp.lt.s32.totalorder %s23_s28, %s23_s28 }
  0x2e   :  { %p1553_p5 = scmp.ne.s32.totalorder %s23_s28, %s1552_s3  ;;  %p1558_p7 = scmp.lt.s32.totalorder %s1552_s3, %s1552_s3 }
  0x30   :  { %p1559_p8 = por %p1558_p7, %p1557_p6 }
  0x32   :  { %p1560_p9 = pnand %p1559_p8, %p1553_p5 }
  0x34   :  { %1563 = shalt.err (!%p1560_p9)
}
  0x35   :  { %28 = dma.hbm_to_vmem [thread:$0]  %s1885_s0, 512, %s23_s28, [#allocation5], %s1664_s13, %s1664_s13, %s1665_s14  }
  0x36   :  { %s1564_s20 = scalar_lea.hbm %s1887_s2, 512 }
  0x37   :  { %p1565_p10 = scmp.ne.s32.totalorder %s1887_s2, %s1564_s20  ;;  %p1568_p11 = scmp.lt.u32.totalorder %s1564_s20, %s1887_s2 }
  0x39   :  { %p1570_p12 = pnand %p1568_p11, %p1565_p10 }
  0x3b   :  { %1573 = shalt.err (!%p1570_p12)
}
  0x3c   :  { %s1574_s1 = scalar_lea.vmem %s1749_s30, 512  ;;  %p1579_p0 = scmp.lt.s32.totalorder %s1749_s30, %s1749_s30 }
  0x3d   :  { %p1575_p13 = scmp.ne.s32.totalorder %s1749_s30, %s1574_s1  ;;  %p1580_p1 = scmp.lt.s32.totalorder %s1574_s1, %s1574_s1 }
  0x3f   :  { %p1581_p2 = por %p1580_p1, %p1579_p0 }
  0x41   :  { %p1582_p3 = pnand %p1581_p2, %p1575_p13 }
  0x43   :  { %1585 = shalt.err (!%p1582_p3)
}
  0x44   :  { %52 = dma.hbm_to_vmem [thread:$0]  %s1887_s2, 512, %s1749_s30, [#allocation8], %s1664_s13, %s1664_s13, %s1665_s14  }
  0x45   :  { %s1668_s26 = smov [#allocation12]   ;;  %s1669_s29 = smov [#allocation13]  }
  0x46   :  { %s70_s28 = sshll.u32 %s1668_s26, 4  ;;  %s82_s8 = sshll.u32 %s1669_s29, 4  ;;  %s71_s28 = int_to_ptr.vmem [resolvable:$true] %s70_s28  ;;  %s1786_s8 = int_to_ptr.vmem [resolvable:$true] %s82_s8 }
  0x47   :  { %s1586_s11 = scalar_lea.hbm %s1889_s4, 512 }
  0x48   :  { %p1587_p4 = scmp.ne.s32.totalorder %s1889_s4, %s1586_s11  ;;  %p1590_p5 = scmp.lt.u32.totalorder %s1586_s11, %s1889_s4 }
  0x4a   :  { %p1592_p6 = pnand %p1590_p5, %p1587_p4 }
  0x4c   :  { %1595 = shalt.err (!%p1592_p6)
}
  0x4d   :  { %s1596_s2 = scalar_lea.vmem %s71_s28, 512  ;;  %p1601_p8 = scmp.lt.s32.totalorder %s71_s28, %s71_s28 }
  0x4e   :  { %p1597_p7 = scmp.ne.s32.totalorder %s71_s28, %s1596_s2  ;;  %p1602_p9 = scmp.lt.s32.totalorder %s1596_s2, %s1596_s2 }
  0x50   :  { %p1603_p10 = por %p1602_p9, %p1601_p8 }
  0x52   :  { %p1604_p11 = pnand %p1603_p10, %p1597_p7 }
  0x54   :  { %1607 = shalt.err (!%p1604_p11)
}
  0x55   :  { %76 = dma.hbm_to_vmem [thread:$0]  %s1889_s4, 512, %s71_s28, [#allocation11], %s1664_s13, %s1664_s13, %s1665_s14  }
  0x56   :  { %s1608_s19 = scalar_lea.hbm %s1890_s5, 1024 }
  0x57   :  { %p1609_p12 = scmp.ne.s32.totalorder %s1890_s5, %s1608_s19  ;;  %p1612_p13 = scmp.lt.u32.totalorder %s1608_s19, %s1890_s5 }
  0x59   :  { %p1614_p0 = pnand %p1612_p13, %p1609_p12 }
  0x5b   :  { %1617 = shalt.err (!%p1614_p0)
}
  0x5c   :  { %s1618_s24 = scalar_lea.vmem %s1786_s8, 1024  ;;  %p1623_p2 = scmp.lt.s32.totalorder %s1786_s8, %s1786_s8 }
  0x5d   :  { %p1619_p1 = scmp.ne.s32.totalorder %s1786_s8, %s1618_s24  ;;  %p1624_p3 = scmp.lt.s32.totalorder %s1618_s24, %s1618_s24 }
  0x5f   :  { %p1625_p4 = por %p1624_p3, %p1623_p2 }
  0x61   :  { %p1626_p5 = pnand %p1625_p4, %p1619_p1 }
  0x63   :  { %1629 = shalt.err (!%p1626_p5)
}
  0x64   :  { %88 = dma.hbm_to_vmem [thread:$0]  %s1890_s5, 1024, %s1786_s8, [#allocation14], %s1664_s13, %s1664_s13, %s1665_s14  }
  0x65   :  { %1652 = dma.done.wait [#allocation5], 512  }
  0x66   :  { %1653 = vsyncadd [#allocation5], 4294966784 }
  0x67   :  { %1654 = dma.done.wait [#allocation8], 3584  }
  0x68   :  { %1655 = vsyncadd [#allocation8], 4294963712 }
  0x69   :  { %1656 = dma.done.wait [#allocation11], 6656  }
  0x6a   :  { %1657 = vsyncadd [#allocation11], 4294960640 }
  0x6b   :  { %1658 = dma.done.wait [#allocation14], 1024  }
  0x6c   :  { %1659 = vsyncadd [#allocation14], 4294966272  ;;  %vm109_vm0 = vcmask 516096   ;;  %v1670_v0 = vmov 0.0   ;;  %v135_v1 = vld [vmem:[#allocation7] sm:$0xff]  ;;  %v136_v2 = vld [vmem:[#allocation7 + $0x8] sm:$0xff] }
  0x6d   :  { %110 = vst.msk [vmem:[#allocation2] sm:$0x1] %vm109_vm0, %v1670_v0  ;;  %111 = vst.msk [vmem:[#allocation2 + $0x18] sm:$0x1] %vm109_vm0, %v1670_v0  ;;  %v137_v3 = vld [vmem:[#allocation7 + $0x10] sm:$0xff]  ;;  %vm122_vm1 = vcmask 523264   ;;  %v1304_v4 = vpack.c.bf16 %v136_v2, %v135_v1 }
  0x6e   :  { %112 = vst.msk [vmem:[#allocation2 + $0x11] sm:$0x1] %vm109_vm0, %v1670_v0  ;;  %113 = vst.msk [vmem:[#allocation2 + $0x29] sm:$0x1] %vm109_vm0, %v1670_v0  ;;  %v138_v5 = vld [vmem:[#allocation7 + $0x18] sm:$0xff]  ;;  %v139_v7 = vld [vmem:[#allocation7 + $0x20] sm:$0xff] }
  0x6f   :  { %114 = vst [vmem:[#allocation3] sm:$0x1] %v1670_v0  ;;  %115 = vst [vmem:[#allocation3 + $0x18] sm:$0x1] %v1670_v0  ;;  %v1308_v6 = vpack.c.bf16 %v138_v5, %v137_v3  ;;  %v140_v8 = vld [vmem:[#allocation7 + $0x28] sm:$0xff]  ;;  %v1823_v9 = vld [vmem:[#allocation4] sm:$0xff]  ;;  %1305 = vmatprep.subr.bf16.mxu0 %v1304_v4 }
  0x70   :  { %116 = vst [vmem:[#allocation3 + $0x11] sm:$0x1] %v1670_v0  ;;  %117 = vst [vmem:[#allocation3 + $0x29] sm:$0x1] %v1670_v0  ;;  %v1827_v10 = vld [vmem:[#allocation4 + $0x8] sm:$0xff]  ;;  %1307 = vmatpush3.bf16.msra.mxu0 %v1304_v4  ;;  %v1312_v11 = vpack.c.bf16 %v140_v8, %v139_v7  ;;  %v1831_v12 = vld [vmem:[#allocation4 + $0x10] sm:$0xff] }
  0x71   :  { %123 = vst.msk [vmem:[#allocation2 + $0x1] sm:$0xff] %vm122_vm1, %v1823_v9  ;;  %124 = vst.msk [vmem:[#allocation2 + $0x9] sm:$0xff] %vm122_vm1, %v1827_v10  ;;  %1309 = vmatprep.subr.bf16.mxu0 %v1308_v6  ;;  %v141_v13 = vld [vmem:[#allocation7 + $0x30] sm:$0xff]  ;;  %v142_v14 = vld [vmem:[#allocation7 + $0x38] sm:$0xff] }
  0x72   :  { %125 = vst.msk [vmem:[#allocation2 + $0x19] sm:$0xff] %vm122_vm1, %v1831_v12  ;;  %v1835_v15 = vld [vmem:[#allocation4 + $0x18] sm:$0xff]  ;;  %v1316_v16 = vpack.c.bf16 %v142_v14, %v141_v13  ;;  %v249_v17 = vld [vmem:[#allocation7 + $0x40] sm:$0xff]  ;;  %v497_v19 = vld [vmem:[#allocation10 + $0x8] sm:$0xff] }
  0x73   :  { %126 = vst.msk [vmem:[#allocation2 + $0x21] sm:$0xff] %vm122_vm1, %v1835_v15  ;;  %v496_v18 = vld [vmem:[#allocation10] sm:$0xff]  ;;  %v250_v21 = vld [vmem:[#allocation7 + $0x48] sm:$0xff]  ;;  %v498_v23 = vld [vmem:[#allocation10 + $0x10] sm:$0xff] }
  0x74   :  { %1311 = vmatpush3.bf16.msra.mxu0 %v1308_v6  ;;  %v1352_v22 = vpack.c.bf16 %v497_v19, %v496_v18  ;;  %v499_v24 = vld [vmem:[#allocation10 + $0x18] sm:$0xff]  ;;  %v500_v25 = vld [vmem:[#allocation10 + $0x20] sm:$0xff]  ;;  %v1320_v26 = vpack.c.bf16 %v250_v21, %v249_v17  ;;  %v501_v28 = vld [vmem:[#allocation10 + $0x28] sm:$0xff] }
  0x75   :  { %1313 = vmatprep.subr.bf16.mxu0 %v1312_v11  ;;  %v1356_v27 = vpack.c.bf16 %v499_v24, %v498_v23  ;;  %v251_v29 = vld [vmem:[#allocation7 + $0x50] sm:$0xff]  ;;  %v252_v30 = vld [vmem:[#allocation7 + $0x58] sm:$0xff]  ;;  %v1360_v31 = vpack.c.bf16 %v501_v28, %v500_v25  ;;  %v253_v37 = vld [vmem:[#allocation7 + $0x60] sm:$0xff] }
  0x76   :  { %1353 = vmatprep.subr.bf16.mxu1 %v1352_v22  ;;  %v502_v32 = vld [vmem:[#allocation10 + $0x30] sm:$0xff]  ;;  %v503_v33 = vld [vmem:[#allocation10 + $0x38] sm:$0xff]  ;;  %v1324_v35 = vpack.c.bf16 %v252_v30, %v251_v29  ;;  %v254_v38 = vld [vmem:[#allocation7 + $0x68] sm:$0xff] }
  0x77   :  { %1355 = vmatpush3.bf16.msra.mxu1 %v1352_v22  ;;  %v1364_v39 = vpack.c.bf16 %v503_v33, %v502_v32  ;;  %v504_v40 = vld [vmem:[#allocation10 + $0x40] sm:$0xff]  ;;  %v505_v41 = vld [vmem:[#allocation10 + $0x48] sm:$0xff]  ;;  %v1328_v43 = vpack.c.bf16 %v254_v38, %v253_v37  ;;  %v255_v45 = vld [vmem:[#allocation7 + $0x70] sm:$0xff] }
  0x78   :  { %v131_v20 = vld [vmem:[#allocation2] sm:$0xff]  ;;  %1315 = vmatpush3.bf16.msra.mxu0 %v1312_v11  ;;  %1357 = vmatprep.subr.bf16.mxu1 %v1356_v27  ;;  %v132_v34 = vld [vmem:[#allocation2 + $0x8] sm:$0xff]  ;;  %v256_v46 = vld [vmem:[#allocation7 + $0x78] sm:$0xff]  ;;  %v1368_v47 = vpack.c.bf16 %v505_v41, %v504_v40 }
  0x79   :  { %1118 = vmatprep.mubr.msk.f32.mxu0 %vm122_vm1, %v131_v20  ;;  %1317 = vmatprep.subr.bf16.mxu0 %v1316_v16  ;;  %v133_v36 = vld [vmem:[#allocation2 + $0x18] sm:$0xff]  ;;  %v244_v44 = vld [vmem:[#allocation2 + $0x1] sm:$0xff]  ;;  %v1332_v48 = vpack.c.bf16 %v256_v46, %v255_v45  ;;  %v365_v52 = vld [vmem:[#allocation7 + $0x90] sm:$0xff] }
  0x7a   :  { %v134_v42 = vld [vmem:[#allocation2 + $0x20] sm:$0xff]  ;;  %v364_v50 = vld [vmem:[#allocation7 + $0x88] sm:$0xff]  ;;  %v366_v53 = vld [vmem:[#allocation7 + $0x98] sm:$0xff] }
  0x7b   :  { %1359 = vmatpush3.bf16.msra.mxu1 %v1356_v27  ;;  %v363_v49 = vld [vmem:[#allocation7 + $0x80] sm:$0xff]  ;;  %v245_v54 = vld [vmem:[#allocation2 + $0x9] sm:$0xff]  ;;  %v1340_v55 = vpack.c.bf16 %v366_v53, %v365_v52  ;;  %v370_v63 = vld [vmem:[#allocation7 + $0xb8] sm:$0xff] }
  0x7c   :  { %1319 = vmatpush3.bf16.msra.mxu0 %v1316_v16  ;;  %1361 = vmatprep.subr.bf16.mxu1 %v1360_v31  ;;  %v1336_v51 = vpack.c.bf16 %v364_v50, %v363_v49  ;;  %v246_v56 = vld [vmem:[#allocation2 + $0x19] sm:$0xff]  ;;  %v368_v58 = vld [vmem:[#allocation7 + $0xa8] sm:$0xff]  ;;  %v369_v62 = vld [vmem:[#allocation7 + $0xb0] sm:$0xff] }
  0x7d   :  { %1321 = vmatprep.subr.bf16.mxu0 %v1320_v26  ;;  %v367_v57 = vld [vmem:[#allocation7 + $0xa0] sm:$0xff]  ;;  %v1348_v0 = vpack.c.bf16 %v370_v63, %v369_v62  ;;  %v359_v1 = vld [vmem:[#allocation2 + $0xa] sm:$0xff]  ;;  %v507_v5 = vld [vmem:[#allocation10 + $0x58] sm:$0xff] }
  0x7e   :  { %v247_v59 = vld [vmem:[#allocation2 + $0x21] sm:$0xff]  ;;  %v1344_v60 = vpack.c.bf16 %v368_v58, %v367_v57  ;;  %v506_v4 = vld [vmem:[#allocation10 + $0x50] sm:$0xff]  ;;  %v511_v14 = vld [vmem:[#allocation10 + $0x78] sm:$0xff] }
  0x7f   :  { %1119 = vmatmul.mubr.msk.f32.vlgmr.msra.gmra.mrb[0].mxu0 %vm122_vm1, %v132_v34  ;;  %1363 = vmatpush3.bf16.msra.mxu1 %v1360_v31  ;;  %v358_v61 = vld [vmem:[#allocation2 + $0x2] sm:$0xff]  ;;  %v360_v2 = vld [vmem:[#allocation2 + $0x1a] sm:$0xff]  ;;  %v1372_v6 = vpack.c.bf16 %v507_v5, %v506_v4  ;;  %v510_v13 = vld [vmem:[#allocation10 + $0x70] sm:$0xff] }
  0x80   :  { %1323 = vmatpush3.bf16.msra.mxu0 %v1320_v26  ;;  %1121 = vmatprep.mubr.msk.f32.mxu0 %vm122_vm1, %v133_v36  ;;  %v361_v3 = vld [vmem:[#allocation2 + $0x22] sm:$0xff]  ;;  %v1380_v16 = vpack.c.bf16 %v511_v14, %v510_v13  ;;  %v835_v22 = vld [vmem:[#allocation13 + $0x10] sm:$0xff]  ;;  %v836_v23 = vld [vmem:[#allocation13 + $0x18] sm:$0xff] }
  0x81   :  { %1325 = vmatprep.subr.bf16.mxu0 %v1324_v35  ;;  %1365 = vmatprep.subr.bf16.mxu1 %v1364_v39  ;;  %v508_v7 = vld [vmem:[#allocation10 + $0x60] sm:$0xff]  ;;  %v509_v8 = vld [vmem:[#allocation10 + $0x68] sm:$0xff]  ;;  %v1452_v24 = vpack.c.bf16 %v836_v23, %v835_v22  ;;  %v839_v28 = vld [vmem:[#allocation13 + $0x30] sm:$0xff] }
  0x82   :  { %v1376_v11 = vpack.c.bf16 %v509_v8, %v508_v7  ;;  %v606_v17 = vld [vmem:[#allocation10 + $0x80] sm:$0xff]  ;;  %v607_v18 = vld [vmem:[#allocation10 + $0x88] sm:$0xff]  ;;  %v840_v29 = vld [vmem:[#allocation13 + $0x38] sm:$0xff] }
  0x83   :  { %1122 = vmatmul.mubr.msk.f32.gmra.mrb[2].mxu0 %vm122_vm1, %v134_v42  ;;  %1367 = vmatpush3.bf16.msra.mxu1 %v1364_v39  ;;  %v1384_v19 = vpack.c.bf16 %v607_v18, %v606_v17  ;;  %v834_v20 = vld [vmem:[#allocation13 + $0x8] sm:$0xff]  ;;  %v837_v25 = vld [vmem:[#allocation13 + $0x20] sm:$0xff]  ;;  %v1460_v30 = vpack.c.bf16 %v840_v29, %v839_v28  ;;  %v130_v37 = vld [vmem:[#allocation9 + $0x18] sm:$0xff] }
  0x84   :  { %1327 = vmatpush3.bf16.msra.mxu0 %v1324_v35  ;;  %1140 = vmatprep.mubr.msk.f32.mxu0 %vm122_vm1, %v244_v44  ;;  %v838_v26 = vld [vmem:[#allocation13 + $0x28] sm:$0xff]  ;;  %v127_v32 = vld [vmem:[#allocation9] sm:$0xff]  ;;  %v129_v39 = vld [vmem:[#allocation9 + $0x10] sm:$0xff] }
  0x85   :  { %1329 = vmatprep.subr.bf16.mxu0 %v1328_v43  ;;  %1369 = vmatprep.subr.bf16.mxu1 %v1368_v47  ;;  %v1456_v27 = vpack.c.bf16 %v838_v26, %v837_v25  ;;  %v128_v31 = vld [vmem:[#allocation9 + $0x8] sm:$0xff]  ;;  %v609_v49 = vld [vmem:[#allocation10 + $0x98] sm:$0xff]  ;;  %v610_v53 = vld [vmem:[#allocation10 + $0xa0] sm:$0xff] }
  0x86   :  { %v612_v58 = vld [vmem:[#allocation10 + $0xb0] sm:$0xff]  ;;  %v615_v62 = vld [vmem:[#allocation10 + $0xc8] sm:$0xff]  ;;  %v621_v7 = vld [vmem:[#allocation10 + $0xf8] sm:$0xff] }
  0x87   :  { %1371 = vmatpush3.bf16.msra.mxu1 %v1368_v47  ;;  %v619_v4 = vld [vmem:[#allocation10 + $0xe8] sm:$0xff]  ;;  %v719_v17 = vld [vmem:[#allocation10 + $0x118] sm:$0xff]  ;;  %v724_v25 = vld [vmem:[#allocation10 + $0x140] sm:$0xff] }
  0x88   :  { %1331 = vmatpush3.bf16.msra.mxu0 %v1328_v43  ;;  %1373 = vmatprep.subr.bf16.mxu1 %v1372_v6  ;;  %v717_v13 = vld [vmem:[#allocation10 + $0x108] sm:$0xff]  ;;  %v723_v22 = vld [vmem:[#allocation10 + $0x138] sm:$0xff]  ;;  %v726_v28 = vld [vmem:[#allocation10 + $0x150] sm:$0xff] }
  0x89   :  { %1333 = vmatprep.subr.bf16.mxu0 %v1332_v48  ;;  %v725_v26 = vld [vmem:[#allocation10 + $0x148] sm:$0xff]  ;;  %v727_v29 = vld [vmem:[#allocation10 + $0x158] sm:$0xff] }
  0x8b   :  { %1375 = vmatpush3.bf16.msra.mxu1 %v1372_v6  ;;  %v620_v6 = vld [vmem:[#allocation10 + $0xf0] sm:$0xff] }
  0x8c   :  { %1335 = vmatpush3.bf16.msra.mxu0 %v1332_v48  ;;  %1377 = vmatprep.subr.bf16.mxu1 %v1376_v11  ;;  %v608_v48 = vld [vmem:[#allocation10 + $0x90] sm:$0xff]  ;;  %v1412_v8 = vpack.c.bf16 %v621_v7, %v620_v6 }
  0x8d   :  { %1337 = vmatprep.subr.bf16.mxu0 %v1336_v51  ;;  %v1388_v52 = vpack.c.bf16 %v609_v49, %v608_v48  ;;  %v491_v49 = vld [vmem:[#allocation12 + $0x18] sm:$0xff] }
  0x8f   :  { %1141 = vmatmul.mubr.msk.f32.vlgmr.msra.gmra.mrb[0].mxu0 %vm122_vm1, %v245_v54  ;;  %1379 = vmatpush3.bf16.msra.mxu1 %v1376_v11  ;;  %v611_v54 = vld [vmem:[#allocation10 + $0xa8] sm:$0xff]  ;;  %v716_v11 = vld [vmem:[#allocation10 + $0x100] sm:$0xff] }
  0x90   :  { %1339 = vmatpush3.bf16.msra.mxu0 %v1336_v51  ;;  %1143 = vmatprep.mubr.msk.f32.mxu0 %vm122_vm1, %v246_v56  ;;  %v1392_v57 = vpack.c.bf16 %v611_v54, %v610_v53  ;;  %v1416_v14 = vpack.c.bf16 %v717_v13, %v716_v11 }
  0x91   :  { %1341 = vmatprep.subr.bf16.mxu0 %v1340_v55  ;;  %1381 = vmatprep.subr.bf16.mxu1 %v1380_v16 }
  0x93   :  { %1144 = vmatmul.mubr.msk.f32.gmra.mrb[2].mxu0 %vm122_vm1, %v247_v59  ;;  %1383 = vmatpush3.bf16.msra.mxu1 %v1380_v16  ;;  %v613_v59 = vld [vmem:[#allocation10 + $0xb8] sm:$0xff]  ;;  %v718_v16 = vld [vmem:[#allocation10 + $0x110] sm:$0xff] }
  0x94   :  { %1343 = vmatpush3.bf16.msra.mxu0 %v1340_v55  ;;  %1162 = vmatprep.mubr.msk.f32.mxu0 %vm122_vm1, %v358_v61  ;;  %v614_v61 = vld [vmem:[#allocation10 + $0xc0] sm:$0xff]  ;;  %v1420_v18 = vpack.c.bf16 %v719_v17, %v718_v16 }
  0x95   :  { %1345 = vmatprep.subr.bf16.mxu0 %v1344_v60  ;;  %1385 = vmatprep.subr.bf16.mxu1 %v1384_v19  ;;  %v1400_v63 = vpack.c.bf16 %v615_v62, %v614_v61 }
  0x98   :  { %1347 = vmatpush3.bf16.msra.mxu0 %v1344_v60  ;;  %v1396_v60 = vpack.c.bf16 %v613_v59, %v612_v58 }
  0x99   :  { %1349 = vmatprep.subr.bf16.mxu0 %v1348_v0 }
  0x9c   :  { %1351 = vmatpush3.bf16.msra.mxu0 %v1348_v0  ;;  %v616_v0 = vld [vmem:[#allocation10 + $0xd0] sm:$0xff] }
  0x9f   :  { %1163 = vmatmul.mubr.msk.f32.vlgmr.msra.gmra.mrb[0].mxu0 %vm122_vm1, %v359_v1  ;;  %v617_v1 = vld [vmem:[#allocation10 + $0xd8] sm:$0xff] }
  0xa0   :  { %1165 = vmatprep.mubr.msk.f32.mxu0 %vm122_vm1, %v360_v2  ;;  %v1404_v2 = vpack.c.bf16 %v617_v1, %v616_v0 }
  0xa3   :  { %1166 = vmatmul.mubr.msk.f32.gmra.mrb[2].mxu0 %vm122_vm1, %v361_v3  ;;  %v618_v3 = vld [vmem:[#allocation10 + $0xe0] sm:$0xff] }
  0xa4   :  { %1298 = vmatprep.mubr.msk.f32.mxu0 %vm122_vm1, %v1823_v9  ;;  %v833_v9 = vld [vmem:[#allocation13] sm:$0xff]  ;;  %v1408_v5 = vpack.c.bf16 %v619_v4, %v618_v3 }
  0xa5   :  { %v1448_v21 = vpack.c.bf16 %v834_v20, %v833_v9  ;;  %v721_v9 = vld [vmem:[#allocation10 + $0x128] sm:$0xff] }
  0xa7   :  { %1449 = vmatprep.subr.bf16.mxu0 %v1448_v21 }
  0xa8   :  { %1451 = vmatpush3.bf16.msra.mxu0 %v1448_v21  ;;  %v722_v21 = vld [vmem:[#allocation10 + $0x130] sm:$0xff] }
  0xa9   :  { %1453 = vmatprep.subr.bf16.mxu0 %v1452_v24 }
  0xac   :  { %1455 = vmatpush3.bf16.msra.mxu0 %v1452_v24  ;;  %v1428_v24 = vpack.c.bf16 %v723_v22, %v722_v21 }
  0xad   :  { %1457 = vmatprep.subr.bf16.mxu0 %v1456_v27 }
  0xb0   :  { %1459 = vmatpush3.bf16.msra.mxu0 %v1456_v27  ;;  %v1432_v27 = vpack.c.bf16 %v725_v26, %v724_v25 }
  0xb1   :  { %1461 = vmatprep.subr.bf16.mxu0 %v1460_v30 }
  0xb4   :  { %1463 = vmatpush3.bf16.msra.mxu0 %v1460_v30  ;;  %v1436_v30 = vpack.c.bf16 %v727_v29, %v726_v28 }
  0xb7   :  { %1299 = vmatmul.mubr.msk.f32.vlgmr.msra.gmra.mrb[4].mxu0 %vm122_vm1, %v1827_v10 }
  0xb8   :  { %1301 = vmatprep.mubr.msk.f32.mxu0 %vm122_vm1, %v1831_v12 }
  0xbb   :  { %1302 = vmatmul.mubr.msk.f32.gmra.mrb[6].mxu0 %vm122_vm1, %v1835_v15 }
 0x172   :  { %v1164_v33 = vpop.f32.mrb[0].mxu0 }
 0x173   :  { %v1464_v34 = vadd.f32 %v1164_v33, %v128_v31  ;;  %v449_v35 = vpop.f32.mrb[1].mxu0  ;;  %v728_v31 = vld [vmem:[#allocation10 + $0x160] sm:$0xff] }
 0x174   :  { %v1465_v36 = vadd.f32 %v449_v35, %v127_v32  ;;  %v729_v32 = vld [vmem:[#allocation10 + $0x168] sm:$0xff]  ;;  %v731_v35 = vld [vmem:[#allocation10 + $0x178] sm:$0xff] }
 0x175   :  { %vm473_vm2 = vcmp.ge.f32.partialorder %v1464_v34, 0.0  ;;  %v477_v38 = vmul.f32 0.2, %v1464_v34  ;;  %v1440_v33 = vpack.c.bf16 %v729_v32, %v728_v31 }
 0x176   :  { %vm472_vm3 = vcmp.ge.f32.partialorder %v1465_v36, 0.0  ;;  %v476_v40 = vmul.f32 0.2, %v1465_v36  ;;  %v1167_v41 = vpop.f32.mrb[2].mxu0 }
 0x177   :  { %v1859_v10 = vsel %vm473_vm2, %v1464_v34, %v477_v38  ;;  %v1466_v42 = vadd.f32 %v1167_v41, %v130_v37  ;;  %v459_v12 = vpop.f32.mrb[3].mxu0  ;;  %v730_v34 = vld [vmem:[#allocation10 + $0x170] sm:$0xff] }
 0x178   :  { %485 = vst [vmem:[#allocation3 + $0x9] sm:$0xff] %v1859_v10  ;;  %v480_v15 = vsel %vm472_vm3, %v1465_v36, %v476_v40  ;;  %v1467_v43 = vadd.f32 %v459_v12, %v129_v39  ;;  %v1444_v36 = vpack.c.bf16 %v731_v35, %v730_v34  ;;  %v489_v12 = vld [vmem:[#allocation12 + $0x8] sm:$0xff] }
 0x179   :  { %484 = vst [vmem:[#allocation3 + $0x1] sm:$0xff] %v480_v15  ;;  %vm475_vm4 = vcmp.ge.f32.partialorder %v1466_v42, 0.0  ;;  %v479_v44 = vmul.f32 0.2, %v1466_v42 }
 0x17a   :  { %vm474_vm5 = vcmp.ge.f32.partialorder %v1467_v43, 0.0  ;;  %v478_v45 = vmul.f32 0.2, %v1467_v43 }
 0x17b   :  { %v1862_v46 = vsel %vm475_vm4, %v1466_v42, %v479_v44 }
 0x17c   :  { %487 = vst [vmem:[#allocation3 + $0x21] sm:$0xff] %v1862_v46  ;;  %v482_v47 = vsel %vm474_vm5, %v1467_v43, %v478_v45  ;;  %v989_v43 = vld [vmem:[%s1891_s6] ss:$0 sm:$0xff]  ;;  %s1671_s6 = smov [#allocation15]  }
 0x17d   :  { %486 = vst [vmem:[#allocation3 + $0x19] sm:$0xff] %v482_v47  ;;  %s962_s25 = sshll.u32 %s1671_s6, 4  ;;  %s963_s25 = int_to_ptr.vmem [resolvable:$true] %s962_s25 }
 0x17e   :  { %s1630_s26 = scalar_lea.vmem %s963_s25, 512  ;;  %p1635_p7 = scmp.lt.s32.totalorder %s963_s25, %s963_s25 }
 0x17f   :  { %v712_v37 = vld [vmem:[#allocation3 + $0xa] sm:$0xff]  ;;  %p1631_p6 = scmp.ne.s32.totalorder %s963_s25, %s1630_s26  ;;  %p1636_p8 = scmp.lt.s32.totalorder %s1630_s26, %s1630_s26 }
 0x180   :  { %v492_v50 = vld [vmem:[#allocation3] sm:$0xff]  ;;  %v493_v51 = vld [vmem:[#allocation3 + $0x8] sm:$0xff] }
 0x181   :  { %1200 = vmatprep.mubr.f32.mxu1 %v492_v50  ;;  %v711_v23 = vld [vmem:[#allocation3 + $0x2] sm:$0xff]  ;;  %p1637_p9 = por %p1636_p8, %p1635_p7 }
 0x182   :  { %1201 = vmatmul.mubr.f32.vlgmr.msra.gmra.mrb[0].mxu1 %v493_v51 }
 0x183   :  { %1387 = vmatpush3.bf16.msra.mxu1 %v1384_v19  ;;  %v720_v19 = vld [vmem:[#allocation10 + $0x120] sm:$0xff]  ;;  %v714_v39 = vld [vmem:[#allocation3 + $0x22] sm:$0xff]  ;;  %p1638_p10 = pnand %p1637_p9, %p1631_p6 }
 0x184   :  { %v494_v55 = vld [vmem:[#allocation3 + $0x18] sm:$0xff]  ;;  %1389 = vmatprep.subr.bf16.mxu1 %v1388_v52  ;;  %v495_v56 = vld [vmem:[#allocation3 + $0x20] sm:$0xff]  ;;  %v1424_v20 = vpack.c.bf16 %v721_v9, %v720_v19 }
 0x185   :  { %1203 = vmatprep.mubr.f32.mxu1 %v494_v55  ;;  %v713_v38 = vld [vmem:[#allocation3 + $0x1a] sm:$0xff] }
 0x186   :  { %1204 = vmatmul.mubr.f32.gmra.mrb[2].mxu1 %v495_v56 }
 0x187   :  { %1391 = vmatpush3.bf16.msra.mxu1 %v1388_v52  ;;  %1238 = vmatprep.mubr.f32.mxu1 %v480_v15  ;;  %v488_v15 = vld [vmem:[#allocation12] sm:$0xff]  ;;  %v490_v52 = vld [vmem:[#allocation12 + $0x10] sm:$0xff] }
 0x188   :  { %1393 = vmatprep.subr.bf16.mxu1 %v1392_v57 }
 0x18a   :  { %v1300_v40 = vpop.f32.mrb[4].mxu0 }
 0x18b   :  { %1395 = vmatpush3.bf16.msra.mxu1 %v1392_v57  ;;  %v926_v41 = vpop.f32.mrb[5].mxu0  ;;  %v932_v48 = vadd.f32 %v1300_v40, %v989_v43 }
 0x18c   :  { %1397 = vmatprep.subr.bf16.mxu1 %v1396_v60  ;;  %v927_v51 = vadd.f32 %v989_v43, %v926_v41 }
 0x18f   :  { %1399 = vmatpush3.bf16.msra.mxu1 %v1396_v60 }
 0x190   :  { %1401 = vmatprep.subr.bf16.mxu1 %v1400_v63 }
 0x193   :  { %1403 = vmatpush3.bf16.msra.mxu1 %v1400_v63 }
 0x194   :  { %1405 = vmatprep.subr.bf16.mxu1 %v1404_v2 }
 0x197   :  { %1407 = vmatpush3.bf16.msra.mxu1 %v1404_v2 }
 0x198   :  { %1409 = vmatprep.subr.bf16.mxu1 %v1408_v5 }
 0x19b   :  { %1411 = vmatpush3.bf16.msra.mxu1 %v1408_v5 }
 0x19c   :  { %1413 = vmatprep.subr.bf16.mxu1 %v1412_v8 }
 0x19f   :  { %1415 = vmatpush3.bf16.msra.mxu1 %v1412_v8 }
 0x1a0   :  { %1417 = vmatprep.subr.bf16.mxu1 %v1416_v14 }
 0x1a2   :  { %1239 = vmatmul.mubr.f32.vlgmr.msra.gmra.mrb[0].mxu1 %v1859_v10  ;;  %v1303_v10 = vpop.f32.mrb[6].mxu0 }
 0x1a3   :  { %1241 = vmatprep.mubr.f32.mxu1 %v482_v47  ;;  %1419 = vmatpush3.bf16.msra.mxu1 %v1416_v14  ;;  %v936_v42 = vpop.f32.mrb[7].mxu0  ;;  %v942_v61 = vadd.f32 %v1303_v10, %v989_v43 }
 0x1a4   :  { %1421 = vmatprep.subr.bf16.mxu1 %v1420_v18  ;;  %v937_v0 = vadd.f32 %v989_v43, %v936_v42 }
 0x1a6   :  { %1242 = vmatmul.mubr.f32.gmra.mrb[2].mxu1 %v1862_v46 }
 0x1a7   :  { %1423 = vmatpush3.bf16.msra.mxu1 %v1420_v18  ;;  %1276 = vmatprep.mubr.f32.mxu1 %v711_v23 }
 0x1a8   :  { %1425 = vmatprep.subr.bf16.mxu1 %v1424_v20 }
 0x1ab   :  { %1427 = vmatpush3.bf16.msra.mxu1 %v1424_v20 }
 0x1ac   :  { %1429 = vmatprep.subr.bf16.mxu1 %v1428_v24 }
 0x1af   :  { %1431 = vmatpush3.bf16.msra.mxu1 %v1428_v24 }
 0x1b0   :  { %1433 = vmatprep.subr.bf16.mxu1 %v1432_v27 }
 0x1b3   :  { %1435 = vmatpush3.bf16.msra.mxu1 %v1432_v27 }
 0x1b4   :  { %1437 = vmatprep.subr.bf16.mxu1 %v1436_v30 }
 0x1b7   :  { %1439 = vmatpush3.bf16.msra.mxu1 %v1436_v30 }
 0x1b8   :  { %1441 = vmatprep.subr.bf16.mxu1 %v1440_v33 }
 0x1bb   :  { %1443 = vmatpush3.bf16.msra.mxu1 %v1440_v33 }
 0x1bc   :  { %1445 = vmatprep.subr.bf16.mxu1 %v1444_v36 }
 0x1bf   :  { %1447 = vmatpush3.bf16.msra.mxu1 %v1444_v36 }
 0x1c2   :  { %1277 = vmatmul.mubr.f32.vlgmr.msra.gmra.mrb[0].mxu1 %v712_v37 }
 0x1c3   :  { %1279 = vmatprep.mubr.f32.mxu1 %v713_v38 }
 0x1c6   :  { %1280 = vmatmul.mubr.f32.gmra.mrb[2].mxu1 %v714_v39 }
 0x295   :  { %v1278_v44 = vpop.f32.mrb[0].mxu1 }
 0x296   :  { %v1468_v45 = vadd.f32 %v1278_v44, %v489_v12  ;;  %v798_v46 = vpop.f32.mrb[1].mxu1 }
 0x297   :  { %v1469_v47 = vadd.f32 %v798_v46, %v488_v15 }
 0x298   :  { %vm822_vm6 = vcmp.ge.f32.partialorder %v1468_v45, 0.0  ;;  %v826_v50 = vmul.f32 0.2, %v1468_v45 }
 0x299   :  { %vm821_vm7 = vcmp.ge.f32.partialorder %v1469_v47, 0.0  ;;  %v825_v53 = vmul.f32 0.2, %v1469_v47  ;;  %v1281_v54 = vpop.f32.mrb[2].mxu1 }
 0x29a   :  { %v830_v55 = vsel %vm822_vm6, %v1468_v45, %v826_v50  ;;  %v1470_v56 = vadd.f32 %v1281_v54, %v491_v49  ;;  %v808_v57 = vpop.f32.mrb[3].mxu1 }
 0x29b   :  { %v946_v58 = vadd.f32 %v932_v48, %v830_v55  ;;  %v829_v59 = vsel %vm821_vm7, %v1469_v47, %v825_v53  ;;  %v1471_v60 = vadd.f32 %v808_v57, %v490_v52 }
 0x29c   :  { %v945_v62 = vadd.f32 %v927_v51, %v829_v59  ;;  %vm824_vm8 = vcmp.ge.f32.partialorder %v1470_v56, 0.0  ;;  %v828_v63 = vmul.f32 0.2, %v1470_v56 }
 0x29d   :  { %v950_v1 = vmul.f32 0.70710677, %v946_v58  ;;  %vm823_vm9 = vcmp.ge.f32.partialorder %v1471_v60, 0.0  ;;  %v827_v2 = vmul.f32 0.2, %v1471_v60 }
 0x29e   :  { %v949_v3 = vmul.f32 0.70710677, %v945_v62  ;;  %v832_v4 = vsel %vm824_vm8, %v1470_v56, %v828_v63 }
 0x29f   :  { %954 = vst [vmem:[#allocation15 + $0x8] sm:$0xff] %v950_v1  ;;  %v948_v5 = vadd.f32 %v942_v61, %v832_v4  ;;  %v831_v6 = vsel %vm823_vm9, %v1471_v60, %v827_v2 }
 0x2a0   :  { %953 = vst [vmem:[#allocation15] sm:$0xff] %v949_v3  ;;  %v947_v7 = vadd.f32 %v937_v0, %v831_v6 }
 0x2a1   :  { %v952_v8 = vmul.f32 0.70710677, %v948_v5 }
 0x2a2   :  { %v951_v11 = vmul.f32 0.70710677, %v947_v7 }
 0x2a3   :  { %956 = vst [vmem:[#allocation15 + $0x18] sm:$0xff] %v952_v8 }
 0x2a4   :  { %955 = vst [vmem:[#allocation15 + $0x10] sm:$0xff] %v951_v11 }
 0x2a5   :  { %1641 = shalt.err (!%p1638_p10)
}
 0x2a6   :  { %s1642_s8 = scalar_lea.hbm %s1892_s7, 512 }
 0x2a7   :  { %p1643_p11 = scmp.ne.s32.totalorder %s1892_s7, %s1642_s8  ;;  %p1646_p12 = scmp.lt.u32.totalorder %s1642_s8, %s1892_s7 }
 0x2a9   :  { %p1648_p13 = pnand %p1646_p12, %p1643_p11 }
 0x2ab   :  { %1651 = shalt.err (!%p1648_p13)
}
 0x2ac   :  { %968 = dma.vmem_to_hbm [thread:$0]  %s963_s25, 512, %s1892_s7, [#allocation6], %s1664_s13, %s1664_s13, %s1665_s14  }
 0x2ad   :  { %1660 = dma.done.wait [#allocation6], 512  }
 0x2ae   :  { %1661 = vsyncadd [#allocation6], 4294966784 }
 0x2af   :  { %972 = vsyncpa [#allocation5], 1 }
 0x2b0   :  { %973 = vsyncpa [#allocation8], 1 }
 0x2b1   :  { %974 = vsyncpa [#allocation11], 1 }
 0x2b2   :  { %975 = vsyncpa [#allocation14], 1 }
 0x2b3   :  { %976 = vsyncpa [#allocation6], 1 }

// kernel: tpu_custom_call.1
= control target key start
LH: loop header
LB: loop body
LE: loop exit
PB: predicated region body
PF: predicated region fallthrough
CT: control target
= control target key end

     0   :  { %12 = vsyncpa [#allocation5], 0  ;;  %s1885_s0 = inlined_call_operand.hbm [shape: f32[2,16,64], index: 0, kind: input, shape index: {}]   ;;  %s1886_s1 = inlined_call_operand.hbm [shape: f32[3,64,128], index: 1, kind: input, shape index: {}]   ;;  %s1887_s2 = inlined_call_operand.hbm [shape: f32[32,128], index: 2, kind: input, shape index: {}]   ;;  %s1888_s3 = inlined_call_operand.hbm [shape: f32[3,128,128], index: 3, kind: input, shape index: {}]   ;;  %s1889_s4 = inlined_call_operand.hbm [shape: f32[32,128], index: 4, kind: input, shape index: {}]   ;;  %s1890_s5 = inlined_call_operand.hbm [shape: f32[64,128], index: 5, kind: input, shape index: {}]   ;;  %s1891_s6 = inlined_call_operand.vmem [shape: f32[1,128], index: 6, kind: input, shape index: {}]   ;;  %s1892_s7 = inlined_call_operand.hbm [shape: f32[2,16,128], index: 7, kind: output, shape index: {}]  }
   0x1   :  { %13 = vsyncpa [#allocation8], 0 }
   0x2   :  { %14 = vsyncpa [#allocation11], 0 }
   0x3   :  { %15 = vsyncpa [#allocation14], 0 }
   0x4   :  { %16 = vsyncpa [#allocation6], 0  ;;  %s1662_s24 = smov [#allocation7]   ;;  %s1663_s26 = smov [#allocation10]  }
   0x5   :  { %s34_s25 = sshll.u32 %s1662_s24, 4  ;;  %s58_s27 = sshll.u32 %s1663_s26, 4  ;;  %s35_s25 = int_to_ptr.vmem [resolvable:$true] %s34_s25  ;;  %s1712_s27 = int_to_ptr.vmem [resolvable:$true] %s58_s27 }
   0x6   :  { %s1498_s30 = scalar_lea.hbm %s1886_s1, 3072 }
   0x7   :  { %p1499_p0 = scmp.ne.s32.totalorder %s1886_s1, %s1498_s30  ;;  %p1502_p1 = scmp.lt.u32.totalorder %s1498_s30, %s1886_s1 }
   0x9   :  { %p1504_p2 = pnand %p1502_p1, %p1499_p0 }
   0xb   :  { %1507 = shalt.err (!%p1504_p2)
}
   0xc   :  { %s1508_s12 = scalar_lea.vmem %s35_s25, 3072  ;;  %p1513_p4 = scmp.lt.s32.totalorder %s35_s25, %s35_s25 }
   0xd   :  { %p1509_p3 = scmp.ne.s32.totalorder %s35_s25, %s1508_s12  ;;  %p1514_p5 = scmp.lt.s32.totalorder %s1508_s12, %s1508_s12 }
   0xf   :  { %p1515_p6 = por %p1514_p5, %p1513_p4 }
  0x11   :  { %p1516_p7 = pnand %p1515_p6, %p1509_p3 }
  0x13   :  { %1519 = shalt.err (!%p1516_p7)
}
  0x14   :  { %s1664_s13 = smov 128   ;;  %s1665_s14 = smov 8  }
  0x15   :  { %40 = dma.hbm_to_vmem [thread:$0]  %s1886_s1, 3072, %s35_s25, [#allocation8], %s1664_s13, %s1664_s13, %s1665_s14  }
  0x16   :  { %s1520_s19 = scalar_lea.hbm %s1888_s3, 6144 }
  0x17   :  { %p1521_p8 = scmp.ne.s32.totalorder %s1888_s3, %s1520_s19  ;;  %p1524_p9 = scmp.lt.u32.totalorder %s1520_s19, %s1888_s3 }
  0x19   :  { %p1526_p10 = pnand %p1524_p9, %p1521_p8 }
  0x1b   :  { %1529 = shalt.err (!%p1526_p10)
}
  0x1c   :  { %s1530_s24 = scalar_lea.vmem %s1712_s27, 6144  ;;  %p1535_p12 = scmp.lt.s32.totalorder %s1712_s27, %s1712_s27 }
  0x1d   :  { %p1531_p11 = scmp.ne.s32.totalorder %s1712_s27, %s1530_s24  ;;  %p1536_p13 = scmp.lt.s32.totalorder %s1530_s24, %s1530_s24 }
  0x1f   :  { %p1537_p0 = por %p1536_p13, %p1535_p12 }
  0x21   :  { %p1538_p1 = pnand %p1537_p0, %p1531_p11 }
  0x23   :  { %1541 = shalt.err (!%p1538_p1)
}
  0x24   :  { %64 = dma.hbm_to_vmem [thread:$0]  %s1888_s3, 6144, %s1712_s27, [#allocation11], %s1664_s13, %s1664_s13, %s1665_s14  }
  0x25   :  { %s1666_s26 = smov [#allocation4]   ;;  %s1667_s29 = smov [#allocation9]  }
  0x26   :  { %s22_s28 = sshll.u32 %s1666_s26, 4  ;;  %s46_s30 = sshll.u32 %s1667_s29, 4  ;;  %s23_s28 = int_to_ptr.vmem [resolvable:$true] %s22_s28  ;;  %s1749_s30 = int_to_ptr.vmem [resolvable:$true] %s46_s30 }
  0x27   :  { %s1542_s10 = scalar_lea.hbm %s1885_s0, 512 }
  0x28   :  { %p1543_p2 = scmp.ne.s32.totalorder %s1885_s0, %s1542_s10  ;;  %p1546_p3 = scmp.lt.u32.totalorder %s1542_s10, %s1885_s0 }
  0x2a   :  { %p1548_p4 = pnand %p1546_p3, %p1543_p2 }
  0x2c   :  { %1551 = shalt.err (!%p1548_p4)
}
  0x2d   :  { %s1552_s3 = scalar_lea.vmem %s23_s28, 512  ;;  %p1557_p6 = scmp.lt.s32.totalorder %s23_s28, %s23_s28 }
  0x2e   :  { %p1553_p5 = scmp.ne.s32.totalorder %s23_s28, %s1552_s3  ;;  %p1558_p7 = scmp.lt.s32.totalorder %s1552_s3, %s1552_s3 }
  0x30   :  { %p1559_p8 = por %p1558_p7, %p1557_p6 }
  0x32   :  { %p1560_p9 = pnand %p1559_p8, %p1553_p5 }
  0x34   :  { %1563 = shalt.err (!%p1560_p9)
}
  0x35   :  { %28 = dma.hbm_to_vmem [thread:$0]  %s1885_s0, 512, %s23_s28, [#allocation5], %s1664_s13, %s1664_s13, %s1665_s14  }
  0x36   :  { %s1564_s20 = scalar_lea.hbm %s1887_s2, 512 }
  0x37   :  { %p1565_p10 = scmp.ne.s32.totalorder %s1887_s2, %s1564_s20  ;;  %p1568_p11 = scmp.lt.u32.totalorder %s1564_s20, %s1887_s2 }
  0x39   :  { %p1570_p12 = pnand %p1568_p11, %p1565_p10 }
  0x3b   :  { %1573 = shalt.err (!%p1570_p12)
}
  0x3c   :  { %s1574_s1 = scalar_lea.vmem %s1749_s30, 512  ;;  %p1579_p0 = scmp.lt.s32.totalorder %s1749_s30, %s1749_s30 }
  0x3d   :  { %p1575_p13 = scmp.ne.s32.totalorder %s1749_s30, %s1574_s1  ;;  %p1580_p1 = scmp.lt.s32.totalorder %s1574_s1, %s1574_s1 }
  0x3f   :  { %p1581_p2 = por %p1580_p1, %p1579_p0 }
  0x41   :  { %p1582_p3 = pnand %p1581_p2, %p1575_p13 }
  0x43   :  { %1585 = shalt.err (!%p1582_p3)
}
  0x44   :  { %52 = dma.hbm_to_vmem [thread:$0]  %s1887_s2, 512, %s1749_s30, [#allocation8], %s1664_s13, %s1664_s13, %s1665_s14  }
  0x45   :  { %s1668_s26 = smov [#allocation12]   ;;  %s1669_s29 = smov [#allocation13]  }
  0x46   :  { %s70_s28 = sshll.u32 %s1668_s26, 4  ;;  %s82_s8 = sshll.u32 %s1669_s29, 4  ;;  %s71_s28 = int_to_ptr.vmem [resolvable:$true] %s70_s28  ;;  %s1786_s8 = int_to_ptr.vmem [resolvable:$true] %s82_s8 }
  0x47   :  { %s1586_s11 = scalar_lea.hbm %s1889_s4, 512 }
  0x48   :  { %p1587_p4 = scmp.ne.s32.totalorder %s1889_s4, %s1586_s11  ;;  %p1590_p5 = scmp.lt.u32.totalorder %s1586_s11, %s1889_s4 }
  0x4a   :  { %p1592_p6 = pnand %p1590_p5, %p1587_p4 }
  0x4c   :  { %1595 = shalt.err (!%p1592_p6)
}
  0x4d   :  { %s1596_s2 = scalar_lea.vmem %s71_s28, 512  ;;  %p1601_p8 = scmp.lt.s32.totalorder %s71_s28, %s71_s28 }
  0x4e   :  { %p1597_p7 = scmp.ne.s32.totalorder %s71_s28, %s1596_s2  ;;  %p1602_p9 = scmp.lt.s32.totalorder %s1596_s2, %s1596_s2 }
  0x50   :  { %p1603_p10 = por %p1602_p9, %p1601_p8 }
  0x52   :  { %p1604_p11 = pnand %p1603_p10, %p1597_p7 }
  0x54   :  { %1607 = shalt.err (!%p1604_p11)
}
  0x55   :  { %76 = dma.hbm_to_vmem [thread:$0]  %s1889_s4, 512, %s71_s28, [#allocation11], %s1664_s13, %s1664_s13, %s1665_s14  }
  0x56   :  { %s1608_s19 = scalar_lea.hbm %s1890_s5, 1024 }
  0x57   :  { %p1609_p12 = scmp.ne.s32.totalorder %s1890_s5, %s1608_s19  ;;  %p1612_p13 = scmp.lt.u32.totalorder %s1608_s19, %s1890_s5 }
  0x59   :  { %p1614_p0 = pnand %p1612_p13, %p1609_p12 }
  0x5b   :  { %1617 = shalt.err (!%p1614_p0)
}
  0x5c   :  { %s1618_s24 = scalar_lea.vmem %s1786_s8, 1024  ;;  %p1623_p2 = scmp.lt.s32.totalorder %s1786_s8, %s1786_s8 }
  0x5d   :  { %p1619_p1 = scmp.ne.s32.totalorder %s1786_s8, %s1618_s24  ;;  %p1624_p3 = scmp.lt.s32.totalorder %s1618_s24, %s1618_s24 }
  0x5f   :  { %p1625_p4 = por %p1624_p3, %p1623_p2 }
  0x61   :  { %p1626_p5 = pnand %p1625_p4, %p1619_p1 }
  0x63   :  { %1629 = shalt.err (!%p1626_p5)
}
  0x64   :  { %88 = dma.hbm_to_vmem [thread:$0]  %s1890_s5, 1024, %s1786_s8, [#allocation14], %s1664_s13, %s1664_s13, %s1665_s14  }
  0x65   :  { %1652 = dma.done.wait [#allocation5], 512  }
  0x66   :  { %1653 = vsyncadd [#allocation5], 4294966784 }
  0x67   :  { %1654 = dma.done.wait [#allocation8], 3584  }
  0x68   :  { %1655 = vsyncadd [#allocation8], 4294963712 }
  0x69   :  { %1656 = dma.done.wait [#allocation11], 6656  }
  0x6a   :  { %1657 = vsyncadd [#allocation11], 4294960640 }
  0x6b   :  { %1658 = dma.done.wait [#allocation14], 1024  }
  0x6c   :  { %1659 = vsyncadd [#allocation14], 4294966272  ;;  %vm109_vm0 = vcmask 516096   ;;  %v1670_v0 = vmov 0.0   ;;  %v135_v1 = vld [vmem:[#allocation7] sm:$0xff]  ;;  %v136_v2 = vld [vmem:[#allocation7 + $0x8] sm:$0xff] }
  0x6d   :  { %110 = vst.msk [vmem:[#allocation2] sm:$0x1] %vm109_vm0, %v1670_v0  ;;  %111 = vst.msk [vmem:[#allocation2 + $0x18] sm:$0x1] %vm109_vm0, %v1670_v0  ;;  %v137_v3 = vld [vmem:[#allocation7 + $0x10] sm:$0xff]  ;;  %vm122_vm1 = vcmask 523264   ;;  %v1304_v4 = vpack.c.bf16 %v136_v2, %v135_v1 }
  0x6e   :  { %112 = vst.msk [vmem:[#allocation2 + $0x11] sm:$0x1] %vm109_vm0, %v1670_v0  ;;  %113 = vst.msk [vmem:[#allocation2 + $0x29] sm:$0x1] %vm109_vm0, %v1670_v0  ;;  %v138_v5 = vld [vmem:[#allocation7 + $0x18] sm:$0xff]  ;;  %v139_v7 = vld [vmem:[#allocation7 + $0x20] sm:$0xff] }
  0x6f   :  { %114 = vst [vmem:[#allocation3] sm:$0x1] %v1670_v0  ;;  %115 = vst [vmem:[#allocation3 + $0x18] sm:$0x1] %v1670_v0  ;;  %v1308_v6 = vpack.c.bf16 %v138_v5, %v137_v3  ;;  %v140_v8 = vld [vmem:[#allocation7 + $0x28] sm:$0xff]  ;;  %v1823_v9 = vld [vmem:[#allocation4] sm:$0xff]  ;;  %1305 = vmatprep.subr.bf16.mxu0 %v1304_v4 }
  0x70   :  { %116 = vst [vmem:[#allocation3 + $0x11] sm:$0x1] %v1670_v0  ;;  %117 = vst [vmem:[#allocation3 + $0x29] sm:$0x1] %v1670_v0  ;;  %v1827_v10 = vld [vmem:[#allocation4 + $0x8] sm:$0xff]  ;;  %1307 = vmatpush3.bf16.msra.mxu0 %v1304_v4  ;;  %v1312_v11 = vpack.c.bf16 %v140_v8, %v139_v7  ;;  %v1831_v12 = vld [vmem:[#allocation4 + $0x10] sm:$0xff] }
  0x71   :  { %123 = vst.msk [vmem:[#allocation2 + $0x1] sm:$0xff] %vm122_vm1, %v1823_v9  ;;  %124 = vst.msk [vmem:[#allocation2 + $0x9] sm:$0xff] %vm122_vm1, %v1827_v10  ;;  %1309 = vmatprep.subr.bf16.mxu0 %v1308_v6  ;;  %v141_v13 = vld [vmem:[#allocation7 + $0x30] sm:$0xff]  ;;  %v142_v14 = vld [vmem:[#allocation7 + $0x38] sm:$0xff] }
  0x72   :  { %125 = vst.msk [vmem:[#allocation2 + $0x19] sm:$0xff] %vm122_vm1, %v1831_v12  ;;  %v1835_v15 = vld [vmem:[#allocation4 + $0x18] sm:$0xff]  ;;  %v1316_v16 = vpack.c.bf16 %v142_v14, %v141_v13  ;;  %v249_v17 = vld [vmem:[#allocation7 + $0x40] sm:$0xff]  ;;  %v497_v19 = vld [vmem:[#allocation10 + $0x8] sm:$0xff] }
  0x73   :  { %126 = vst.msk [vmem:[#allocation2 + $0x21] sm:$0xff] %vm122_vm1, %v1835_v15  ;;  %v496_v18 = vld [vmem:[#allocation10] sm:$0xff]  ;;  %v250_v21 = vld [vmem:[#allocation7 + $0x48] sm:$0xff]  ;;  %v498_v23 = vld [vmem:[#allocation10 + $0x10] sm:$0xff] }
  0x74   :  { %1311 = vmatpush3.bf16.msra.mxu0 %v1308_v6  ;;  %v1352_v22 = vpack.c.bf16 %v497_v19, %v496_v18  ;;  %v499_v24 = vld [vmem:[#allocation10 + $0x18] sm:$0xff]  ;;  %v500_v25 = vld [vmem:[#allocation10 + $0x20] sm:$0xff]  ;;  %v1320_v26 = vpack.c.bf16 %v250_v21, %v249_v17  ;;  %v501_v28 = vld [vmem:[#allocation10 + $0x28] sm:$0xff] }
  0x75   :  { %1313 = vmatprep.subr.bf16.mxu0 %v1312_v11  ;;  %v1356_v27 = vpack.c.bf16 %v499_v24, %v498_v23  ;;  %v251_v29 = vld [vmem:[#allocation7 + $0x50] sm:$0xff]  ;;  %v252_v30 = vld [vmem:[#allocation7 + $0x58] sm:$0xff]  ;;  %v1360_v31 = vpack.c.bf16 %v501_v28, %v500_v25  ;;  %v253_v37 = vld [vmem:[#allocation7 + $0x60] sm:$0xff] }
  0x76   :  { %1353 = vmatprep.subr.bf16.mxu1 %v1352_v22  ;;  %v502_v32 = vld [vmem:[#allocation10 + $0x30] sm:$0xff]  ;;  %v503_v33 = vld [vmem:[#allocation10 + $0x38] sm:$0xff]  ;;  %v1324_v35 = vpack.c.bf16 %v252_v30, %v251_v29  ;;  %v254_v38 = vld [vmem:[#allocation7 + $0x68] sm:$0xff] }
  0x77   :  { %1355 = vmatpush3.bf16.msra.mxu1 %v1352_v22  ;;  %v1364_v39 = vpack.c.bf16 %v503_v33, %v502_v32  ;;  %v504_v40 = vld [vmem:[#allocation10 + $0x40] sm:$0xff]  ;;  %v505_v41 = vld [vmem:[#allocation10 + $0x48] sm:$0xff]  ;;  %v1328_v43 = vpack.c.bf16 %v254_v38, %v253_v37  ;;  %v255_v45 = vld [vmem:[#allocation7 + $0x70] sm:$0xff] }
  0x78   :  { %v131_v20 = vld [vmem:[#allocation2] sm:$0xff]  ;;  %1315 = vmatpush3.bf16.msra.mxu0 %v1312_v11  ;;  %1357 = vmatprep.subr.bf16.mxu1 %v1356_v27  ;;  %v132_v34 = vld [vmem:[#allocation2 + $0x8] sm:$0xff]  ;;  %v256_v46 = vld [vmem:[#allocation7 + $0x78] sm:$0xff]  ;;  %v1368_v47 = vpack.c.bf16 %v505_v41, %v504_v40 }
  0x79   :  { %1118 = vmatprep.mubr.msk.f32.mxu0 %vm122_vm1, %v131_v20  ;;  %1317 = vmatprep.subr.bf16.mxu0 %v1316_v16  ;;  %v133_v36 = vld [vmem:[#allocation2 + $0x18] sm:$0xff]  ;;  %v244_v44 = vld [vmem:[#allocation2 + $0x1] sm:$0xff]  ;;  %v1332_v48 = vpack.c.bf16 %v256_v46, %v255_v45  ;;  %v365_v52 = vld [vmem:[#allocation7 + $0x90] sm:$0xff] }
  0x7a   :  { %v134_v42 = vld [vmem:[#allocation2 + $0x20] sm:$0xff]  ;;  %v364_v50 = vld [vmem:[#allocation7 + $0x88] sm:$0xff]  ;;  %v366_v53 = vld [vmem:[#allocation7 + $0x98] sm:$0xff] }
  0x7b   :  { %1359 = vmatpush3.bf16.msra.mxu1 %v1356_v27  ;;  %v363_v49 = vld [vmem:[#allocation7 + $0x80] sm:$0xff]  ;;  %v245_v54 = vld [vmem:[#allocation2 + $0x9] sm:$0xff]  ;;  %v1340_v55 = vpack.c.bf16 %v366_v53, %v365_v52  ;;  %v370_v63 = vld [vmem:[#allocation7 + $0xb8] sm:$0xff] }
  0x7c   :  { %1319 = vmatpush3.bf16.msra.mxu0 %v1316_v16  ;;  %1361 = vmatprep.subr.bf16.mxu1 %v1360_v31  ;;  %v1336_v51 = vpack.c.bf16 %v364_v50, %v363_v49  ;;  %v246_v56 = vld [vmem:[#allocation2 + $0x19] sm:$0xff]  ;;  %v368_v58 = vld [vmem:[#allocation7 + $0xa8] sm:$0xff]  ;;  %v369_v62 = vld [vmem:[#allocation7 + $0xb0] sm:$0xff] }
  0x7d   :  { %1321 = vmatprep.subr.bf16.mxu0 %v1320_v26  ;;  %v367_v57 = vld [vmem:[#allocation7 + $0xa0] sm:$0xff]  ;;  %v1348_v0 = vpack.c.bf16 %v370_v63, %v369_v62  ;;  %v359_v1 = vld [vmem:[#allocation2 + $0xa] sm:$0xff]  ;;  %v507_v5 = vld [vmem:[#allocation10 + $0x58] sm:$0xff] }
  0x7e   :  { %v247_v59 = vld [vmem:[#allocation2 + $0x21] sm:$0xff]  ;;  %v1344_v60 = vpack.c.bf16 %v368_v58, %v367_v57  ;;  %v506_v4 = vld [vmem:[#allocation10 + $0x50] sm:$0xff]  ;;  %v511_v14 = vld [vmem:[#allocation10 + $0x78] sm:$0xff] }
  0x7f   :  { %1119 = vmatmul.mubr.msk.f32.vlgmr.msra.gmra.mrb[0].mxu0 %vm122_vm1, %v132_v34  ;;  %1363 = vmatpush3.bf16.msra.mxu1 %v1360_v31  ;;  %v358_v61 = vld [vmem:[#allocation2 + $0x2] sm:$0xff]  ;;  %v360_v2 = vld [vmem:[#allocation2 + $0x1a] sm:$0xff]  ;;  %v1372_v6 = vpack.c.bf16 %v507_v5, %v506_v4  ;;  %v510_v13 = vld [vmem:[#allocation10 + $0x70] sm:$0xff] }
  0x80   :  { %1323 = vmatpush3.bf16.msra.mxu0 %v1320_v26  ;;  %1121 = vmatprep.mubr.msk.f32.mxu0 %vm122_vm1, %v133_v36  ;;  %v361_v3 = vld [vmem:[#allocation2 + $0x22] sm:$0xff]  ;;  %v1380_v16 = vpack.c.bf16 %v511_v14, %v510_v13  ;;  %v835_v22 = vld [vmem:[#allocation13 + $0x10] sm:$0xff]  ;;  %v836_v23 = vld [vmem:[#allocation13 + $0x18] sm:$0xff] }
  0x81   :  { %1325 = vmatprep.subr.bf16.mxu0 %v1324_v35  ;;  %1365 = vmatprep.subr.bf16.mxu1 %v1364_v39  ;;  %v508_v7 = vld [vmem:[#allocation10 + $0x60] sm:$0xff]  ;;  %v509_v8 = vld [vmem:[#allocation10 + $0x68] sm:$0xff]  ;;  %v1452_v24 = vpack.c.bf16 %v836_v23, %v835_v22  ;;  %v839_v28 = vld [vmem:[#allocation13 + $0x30] sm:$0xff] }
  0x82   :  { %v1376_v11 = vpack.c.bf16 %v509_v8, %v508_v7  ;;  %v606_v17 = vld [vmem:[#allocation10 + $0x80] sm:$0xff]  ;;  %v607_v18 = vld [vmem:[#allocation10 + $0x88] sm:$0xff]  ;;  %v840_v29 = vld [vmem:[#allocation13 + $0x38] sm:$0xff] }
  0x83   :  { %1122 = vmatmul.mubr.msk.f32.gmra.mrb[2].mxu0 %vm122_vm1, %v134_v42  ;;  %1367 = vmatpush3.bf16.msra.mxu1 %v1364_v39  ;;  %v1384_v19 = vpack.c.bf16 %v607_v18, %v606_v17  ;;  %v834_v20 = vld [vmem:[#allocation13 + $0x8] sm:$0xff]  ;;  %v837_v25 = vld [vmem:[#allocation13 + $0x20] sm:$0xff]  ;;  %v1460_v30 = vpack.c.bf16 %v840_v29, %v839_v28  ;;  %v130_v37 = vld [vmem:[#allocation9 + $0x18] sm:$0xff] }
  0x84   :  { %1327 = vmatpush3.bf16.msra.mxu0 %v1324_v35  ;;  %1140 = vmatprep.mubr.msk.f32.mxu0 %vm122_vm1, %v244_v44  ;;  %v838_v26 = vld [vmem:[#allocation13 + $0x28] sm:$0xff]  ;;  %v127_v32 = vld [vmem:[#allocation9] sm:$0xff]  ;;  %v129_v39 = vld [vmem:[#allocation9 + $0x10] sm:$0xff] }
  0x85   :  { %1329 = vmatprep.subr.bf16.mxu0 %v1328_v43  ;;  %1369 = vmatprep.subr.bf16.mxu1 %v1368_v47  ;;  %v1456_v27 = vpack.c.bf16 %v838_v26, %v837_v25  ;;  %v128_v31 = vld [vmem:[#allocation9 + $0x8] sm:$0xff]  ;;  %v609_v49 = vld [vmem:[#allocation10 + $0x98] sm:$0xff]  ;;  %v610_v53 = vld [vmem:[#allocation10 + $0xa0] sm:$0xff] }
  0x86   :  { %v612_v58 = vld [vmem:[#allocation10 + $0xb0] sm:$0xff]  ;;  %v615_v62 = vld [vmem:[#allocation10 + $0xc8] sm:$0xff]  ;;  %v621_v7 = vld [vmem:[#allocation10 + $0xf8] sm:$0xff] }
  0x87   :  { %1371 = vmatpush3.bf16.msra.mxu1 %v1368_v47  ;;  %v619_v4 = vld [vmem:[#allocation10 + $0xe8] sm:$0xff]  ;;  %v719_v17 = vld [vmem:[#allocation10 + $0x118] sm:$0xff]  ;;  %v724_v25 = vld [vmem:[#allocation10 + $0x140] sm:$0xff] }
  0x88   :  { %1331 = vmatpush3.bf16.msra.mxu0 %v1328_v43  ;;  %1373 = vmatprep.subr.bf16.mxu1 %v1372_v6  ;;  %v717_v13 = vld [vmem:[#allocation10 + $0x108] sm:$0xff]  ;;  %v723_v22 = vld [vmem:[#allocation10 + $0x138] sm:$0xff]  ;;  %v726_v28 = vld [vmem:[#allocation10 + $0x150] sm:$0xff] }
  0x89   :  { %1333 = vmatprep.subr.bf16.mxu0 %v1332_v48  ;;  %v725_v26 = vld [vmem:[#allocation10 + $0x148] sm:$0xff]  ;;  %v727_v29 = vld [vmem:[#allocation10 + $0x158] sm:$0xff] }
  0x8b   :  { %1375 = vmatpush3.bf16.msra.mxu1 %v1372_v6  ;;  %v620_v6 = vld [vmem:[#allocation10 + $0xf0] sm:$0xff] }
  0x8c   :  { %1335 = vmatpush3.bf16.msra.mxu0 %v1332_v48  ;;  %1377 = vmatprep.subr.bf16.mxu1 %v1376_v11  ;;  %v608_v48 = vld [vmem:[#allocation10 + $0x90] sm:$0xff]  ;;  %v1412_v8 = vpack.c.bf16 %v621_v7, %v620_v6 }
  0x8d   :  { %1337 = vmatprep.subr.bf16.mxu0 %v1336_v51  ;;  %v1388_v52 = vpack.c.bf16 %v609_v49, %v608_v48  ;;  %v491_v49 = vld [vmem:[#allocation12 + $0x18] sm:$0xff] }
  0x8f   :  { %1141 = vmatmul.mubr.msk.f32.vlgmr.msra.gmra.mrb[0].mxu0 %vm122_vm1, %v245_v54  ;;  %1379 = vmatpush3.bf16.msra.mxu1 %v1376_v11  ;;  %v611_v54 = vld [vmem:[#allocation10 + $0xa8] sm:$0xff]  ;;  %v716_v11 = vld [vmem:[#allocation10 + $0x100] sm:$0xff] }
  0x90   :  { %1339 = vmatpush3.bf16.msra.mxu0 %v1336_v51  ;;  %1143 = vmatprep.mubr.msk.f32.mxu0 %vm122_vm1, %v246_v56  ;;  %v1392_v57 = vpack.c.bf16 %v611_v54, %v610_v53  ;;  %v1416_v14 = vpack.c.bf16 %v717_v13, %v716_v11 }
  0x91   :  { %1341 = vmatprep.subr.bf16.mxu0 %v1340_v55  ;;  %1381 = vmatprep.subr.bf16.mxu1 %v1380_v16 }
  0x93   :  { %1144 = vmatmul.mubr.msk.f32.gmra.mrb[2].mxu0 %vm122_vm1, %v247_v59  ;;  %1383 = vmatpush3.bf16.msra.mxu1 %v1380_v16  ;;  %v613_v59 = vld [vmem:[#allocation10 + $0xb8] sm:$0xff]  ;;  %v718_v16 = vld [vmem:[#allocation10 + $0x110] sm:$0xff] }
  0x94   :  { %1343 = vmatpush3.bf16.msra.mxu0 %v1340_v55  ;;  %1162 = vmatprep.mubr.msk.f32.mxu0 %vm122_vm1, %v358_v61  ;;  %v614_v61 = vld [vmem:[#allocation10 + $0xc0] sm:$0xff]  ;;  %v1420_v18 = vpack.c.bf16 %v719_v17, %v718_v16 }
  0x95   :  { %1345 = vmatprep.subr.bf16.mxu0 %v1344_v60  ;;  %1385 = vmatprep.subr.bf16.mxu1 %v1384_v19  ;;  %v1400_v63 = vpack.c.bf16 %v615_v62, %v614_v61 }
  0x98   :  { %1347 = vmatpush3.bf16.msra.mxu0 %v1344_v60  ;;  %v1396_v60 = vpack.c.bf16 %v613_v59, %v612_v58 }
  0x99   :  { %1349 = vmatprep.subr.bf16.mxu0 %v1348_v0 }
  0x9c   :  { %1351 = vmatpush3.bf16.msra.mxu0 %v1348_v0  ;;  %v616_v0 = vld [vmem:[#allocation10 + $0xd0] sm:$0xff] }
  0x9f   :  { %1163 = vmatmul.mubr.msk.f32.vlgmr.msra.gmra.mrb[0].mxu0 %vm122_vm1, %v359_v1  ;;  %v617_v1 = vld [vmem:[#allocation10 + $0xd8] sm:$0xff] }
  0xa0   :  { %1165 = vmatprep.mubr.msk.f32.mxu0 %vm122_vm1, %v360_v2  ;;  %v1404_v2 = vpack.c.bf16 %v617_v1, %v616_v0 }
  0xa3   :  { %1166 = vmatmul.mubr.msk.f32.gmra.mrb[2].mxu0 %vm122_vm1, %v361_v3  ;;  %v618_v3 = vld [vmem:[#allocation10 + $0xe0] sm:$0xff] }
  0xa4   :  { %1298 = vmatprep.mubr.msk.f32.mxu0 %vm122_vm1, %v1823_v9  ;;  %v833_v9 = vld [vmem:[#allocation13] sm:$0xff]  ;;  %v1408_v5 = vpack.c.bf16 %v619_v4, %v618_v3 }
  0xa5   :  { %v1448_v21 = vpack.c.bf16 %v834_v20, %v833_v9  ;;  %v721_v9 = vld [vmem:[#allocation10 + $0x128] sm:$0xff] }
  0xa7   :  { %1449 = vmatprep.subr.bf16.mxu0 %v1448_v21 }
  0xa8   :  { %1451 = vmatpush3.bf16.msra.mxu0 %v1448_v21  ;;  %v722_v21 = vld [vmem:[#allocation10 + $0x130] sm:$0xff] }
  0xa9   :  { %1453 = vmatprep.subr.bf16.mxu0 %v1452_v24 }
  0xac   :  { %1455 = vmatpush3.bf16.msra.mxu0 %v1452_v24  ;;  %v1428_v24 = vpack.c.bf16 %v723_v22, %v722_v21 }
  0xad   :  { %1457 = vmatprep.subr.bf16.mxu0 %v1456_v27 }
  0xb0   :  { %1459 = vmatpush3.bf16.msra.mxu0 %v1456_v27  ;;  %v1432_v27 = vpack.c.bf16 %v725_v26, %v724_v25 }
  0xb1   :  { %1461 = vmatprep.subr.bf16.mxu0 %v1460_v30 }
  0xb4   :  { %1463 = vmatpush3.bf16.msra.mxu0 %v1460_v30  ;;  %v1436_v30 = vpack.c.bf16 %v727_v29, %v726_v28 }
  0xb7   :  { %1299 = vmatmul.mubr.msk.f32.vlgmr.msra.gmra.mrb[4].mxu0 %vm122_vm1, %v1827_v10 }
  0xb8   :  { %1301 = vmatprep.mubr.msk.f32.mxu0 %vm122_vm1, %v1831_v12 }
  0xbb   :  { %1302 = vmatmul.mubr.msk.f32.gmra.mrb[6].mxu0 %vm122_vm1, %v1835_v15 }
 0x172   :  { %v1164_v33 = vpop.f32.mrb[0].mxu0 }
 0x173   :  { %v1464_v34 = vadd.f32 %v1164_v33, %v128_v31  ;;  %v449_v35 = vpop.f32.mrb[1].mxu0  ;;  %v728_v31 = vld [vmem:[#allocation10 + $0x160] sm:$0xff] }
 0x174   :  { %v1465_v36 = vadd.f32 %v449_v35, %v127_v32  ;;  %v729_v32 = vld [vmem:[#allocation10 + $0x168] sm:$0xff]  ;;  %v731_v35 = vld [vmem:[#allocation10 + $0x178] sm:$0xff] }
 0x175   :  { %vm473_vm2 = vcmp.ge.f32.partialorder %v1464_v34, 0.0  ;;  %v477_v38 = vmul.f32 0.2, %v1464_v34  ;;  %v1440_v33 = vpack.c.bf16 %v729_v32, %v728_v31 }
 0x176   :  { %vm472_vm3 = vcmp.ge.f32.partialorder %v1465_v36, 0.0  ;;  %v476_v40 = vmul.f32 0.2, %v1465_v36  ;;  %v1167_v41 = vpop.f32.mrb[2].mxu0 }
 0x177   :  { %v1859_v10 = vsel %vm473_vm2, %v1464_v34, %v477_v38  ;;  %v1466_v42 = vadd.f32 %v1167_v41, %v130_v37  ;;  %v459_v12 = vpop.f32.mrb[3].mxu0  ;;  %v730_v34 = vld [vmem:[#allocation10 + $0x170] sm:$0xff] }
 0x178   :  { %485 = vst [vmem:[#allocation3 + $0x9] sm:$0xff] %v1859_v10  ;;  %v480_v15 = vsel %vm472_vm3, %v1465_v36, %v476_v40  ;;  %v1467_v43 = vadd.f32 %v459_v12, %v129_v39  ;;  %v1444_v36 = vpack.c.bf16 %v731_v35, %v730_v34  ;;  %v489_v12 = vld [vmem:[#allocation12 + $0x8] sm:$0xff] }
 0x179   :  { %484 = vst [vmem:[#allocation3 + $0x1] sm:$0xff] %v480_v15  ;;  %vm475_vm4 = vcmp.ge.f32.partialorder %v1466_v42, 0.0  ;;  %v479_v44 = vmul.f32 0.2, %v1466_v42 }
 0x17a   :  { %vm474_vm5 = vcmp.ge.f32.partialorder %v1467_v43, 0.0  ;;  %v478_v45 = vmul.f32 0.2, %v1467_v43 }
 0x17b   :  { %v1862_v46 = vsel %vm475_vm4, %v1466_v42, %v479_v44 }
 0x17c   :  { %487 = vst [vmem:[#allocation3 + $0x21] sm:$0xff] %v1862_v46  ;;  %v482_v47 = vsel %vm474_vm5, %v1467_v43, %v478_v45  ;;  %v989_v43 = vld [vmem:[%s1891_s6] ss:$0 sm:$0xff]  ;;  %s1671_s6 = smov [#allocation15]  }
 0x17d   :  { %486 = vst [vmem:[#allocation3 + $0x19] sm:$0xff] %v482_v47  ;;  %s962_s25 = sshll.u32 %s1671_s6, 4  ;;  %s963_s25 = int_to_ptr.vmem [resolvable:$true] %s962_s25 }
 0x17e   :  { %s1630_s26 = scalar_lea.vmem %s963_s25, 512  ;;  %p1635_p7 = scmp.lt.s32.totalorder %s963_s25, %s963_s25 }
 0x17f   :  { %v712_v37 = vld [vmem:[#allocation3 + $0xa] sm:$0xff]  ;;  %p1631_p6 = scmp.ne.s32.totalorder %s963_s25, %s1630_s26  ;;  %p1636_p8 = scmp.lt.s32.totalorder %s1630_s26, %s1630_s26 }
 0x180   :  { %v492_v50 = vld [vmem:[#allocation3] sm:$0xff]  ;;  %v493_v51 = vld [vmem:[#allocation3 + $0x8] sm:$0xff] }
 0x181   :  { %1200 = vmatprep.mubr.f32.mxu1 %v492_v50  ;;  %v711_v23 = vld [vmem:[#allocation3 + $0x2] sm:$0xff]  ;;  %p1637_p9 = por %p1636_p8, %p1635_p7 }
 0x182   :  { %1201 = vmatmul.mubr.f32.vlgmr.msra.gmra.mrb[0].mxu1 %v493_v51 }
 0x183   :  { %1387 = vmatpush3.bf16.msra.mxu1 %v1384_v19  ;;  %v720_v19 = vld [vmem:[#allocation10 + $0x120] sm:$0xff]  ;;  %v714_v39 = vld [vmem:[#allocation3 + $0x22] sm:$0xff]  ;;  %p1638_p10 = pnand %p1637_p9, %p1631_p6 }
 0x184   :  { %v494_v55 = vld [vmem:[#allocation3 + $0x18] sm:$0xff]  ;;  %1389 = vmatprep.subr.bf16.mxu1 %v1388_v52  ;;  %v495_v56 = vld [vmem:[#allocation3 + $0x20] sm:$0xff]  ;;  %v1424_v20 = vpack.c.bf16 %v721_v9, %v720_v19 }
 0x185   :  { %1203 = vmatprep.mubr.f32.mxu1 %v494_v55  ;;  %v713_v38 = vld [vmem:[#allocation3 + $0x1a] sm:$0xff] }
 0x186   :  { %1204 = vmatmul.mubr.f32.gmra.mrb[2].mxu1 %v495_v56 }
 0x187   :  { %1391 = vmatpush3.bf16.msra.mxu1 %v1388_v52  ;;  %1238 = vmatprep.mubr.f32.mxu1 %v480_v15  ;;  %v488_v15 = vld [vmem:[#allocation12] sm:$0xff]  ;;  %v490_v52 = vld [vmem:[#allocation12 + $0x10] sm:$0xff] }
 0x188   :  { %1393 = vmatprep.subr.bf16.mxu1 %v1392_v57 }
 0x18a   :  { %v1300_v40 = vpop.f32.mrb[4].mxu0 }
 0x18b   :  { %1395 = vmatpush3.bf16.msra.mxu1 %v1392_v57  ;;  %v926_v41 = vpop.f32.mrb[5].mxu0  ;;  %v932_v48 = vadd.f32 %v1300_v40, %v989_v43 }
 0x18c   :  { %1397 = vmatprep.subr.bf16.mxu1 %v1396_v60  ;;  %v927_v51 = vadd.f32 %v989_v43, %v926_v41 }
 0x18f   :  { %1399 = vmatpush3.bf16.msra.mxu1 %v1396_v60 }
 0x190   :  { %1401 = vmatprep.subr.bf16.mxu1 %v1400_v63 }
 0x193   :  { %1403 = vmatpush3.bf16.msra.mxu1 %v1400_v63 }
 0x194   :  { %1405 = vmatprep.subr.bf16.mxu1 %v1404_v2 }
 0x197   :  { %1407 = vmatpush3.bf16.msra.mxu1 %v1404_v2 }
 0x198   :  { %1409 = vmatprep.subr.bf16.mxu1 %v1408_v5 }
 0x19b   :  { %1411 = vmatpush3.bf16.msra.mxu1 %v1408_v5 }
 0x19c   :  { %1413 = vmatprep.subr.bf16.mxu1 %v1412_v8 }
 0x19f   :  { %1415 = vmatpush3.bf16.msra.mxu1 %v1412_v8 }
 0x1a0   :  { %1417 = vmatprep.subr.bf16.mxu1 %v1416_v14 }
 0x1a2   :  { %1239 = vmatmul.mubr.f32.vlgmr.msra.gmra.mrb[0].mxu1 %v1859_v10  ;;  %v1303_v10 = vpop.f32.mrb[6].mxu0 }
 0x1a3   :  { %1241 = vmatprep.mubr.f32.mxu1 %v482_v47  ;;  %1419 = vmatpush3.bf16.msra.mxu1 %v1416_v14  ;;  %v936_v42 = vpop.f32.mrb[7].mxu0  ;;  %v942_v61 = vadd.f32 %v1303_v10, %v989_v43 }
 0x1a4   :  { %1421 = vmatprep.subr.bf16.mxu1 %v1420_v18  ;;  %v937_v0 = vadd.f32 %v989_v43, %v936_v42 }
 0x1a6   :  { %1242 = vmatmul.mubr.f32.gmra.mrb[2].mxu1 %v1862_v46 }
 0x1a7   :  { %1423 = vmatpush3.bf16.msra.mxu1 %v1420_v18  ;;  %1276 = vmatprep.mubr.f32.mxu1 %v711_v23 }
 0x1a8   :  { %1425 = vmatprep.subr.bf16.mxu1 %v1424_v20 }
 0x1ab   :  { %1427 = vmatpush3.bf16.msra.mxu1 %v1424_v20 }
 0x1ac   :  { %1429 = vmatprep.subr.bf16.mxu1 %v1428_v24 }
 0x1af   :  { %1431 = vmatpush3.bf16.msra.mxu1 %v1428_v24 }
 0x1b0   :  { %1433 = vmatprep.subr.bf16.mxu1 %v1432_v27 }
 0x1b3   :  { %1435 = vmatpush3.bf16.msra.mxu1 %v1432_v27 }
 0x1b4   :  { %1437 = vmatprep.subr.bf16.mxu1 %v1436_v30 }
 0x1b7   :  { %1439 = vmatpush3.bf16.msra.mxu1 %v1436_v30 }
 0x1b8   :  { %1441 = vmatprep.subr.bf16.mxu1 %v1440_v33 }
 0x1bb   :  { %1443 = vmatpush3.bf16.msra.mxu1 %v1440_v33 }
 0x1bc   :  { %1445 = vmatprep.subr.bf16.mxu1 %v1444_v36 }
 0x1bf   :  { %1447 = vmatpush3.bf16.msra.mxu1 %v1444_v36 }
 0x1c2   :  { %1277 = vmatmul.mubr.f32.vlgmr.msra.gmra.mrb[0].mxu1 %v712_v37 }
 0x1c3   :  { %1279 = vmatprep.mubr.f32.mxu1 %v713_v38 }
 0x1c6   :  { %1280 = vmatmul.mubr.f32.gmra.mrb[2].mxu1 %v714_v39 }
 0x295   :  { %v1278_v44 = vpop.f32.mrb[0].mxu1 }
 0x296   :  { %v1468_v45 = vadd.f32 %v1278_v44, %v489_v12  ;;  %v798_v46 = vpop.f32.mrb[1].mxu1 }
 0x297   :  { %v1469_v47 = vadd.f32 %v798_v46, %v488_v15 }
 0x298   :  { %vm822_vm6 = vcmp.ge.f32.partialorder %v1468_v45, 0.0  ;;  %v826_v50 = vmul.f32 0.2, %v1468_v45 }
 0x299   :  { %vm821_vm7 = vcmp.ge.f32.partialorder %v1469_v47, 0.0  ;;  %v825_v53 = vmul.f32 0.2, %v1469_v47  ;;  %v1281_v54 = vpop.f32.mrb[2].mxu1 }
 0x29a   :  { %v830_v55 = vsel %vm822_vm6, %v1468_v45, %v826_v50  ;;  %v1470_v56 = vadd.f32 %v1281_v54, %v491_v49  ;;  %v808_v57 = vpop.f32.mrb[3].mxu1 }
 0x29b   :  { %v946_v58 = vadd.f32 %v932_v48, %v830_v55  ;;  %v829_v59 = vsel %vm821_vm7, %v1469_v47, %v825_v53  ;;  %v1471_v60 = vadd.f32 %v808_v57, %v490_v52 }
 0x29c   :  { %v945_v62 = vadd.f32 %v927_v51, %v829_v59  ;;  %vm824_vm8 = vcmp.ge.f32.partialorder %v1470_v56, 0.0  ;;  %v828_v63 = vmul.f32 0.2, %v1470_v56 }
 0x29d   :  { %v950_v1 = vmul.f32 0.70710677, %v946_v58  ;;  %vm823_vm9 = vcmp.ge.f32.partialorder %v1471_v60, 0.0  ;;  %v827_v2 = vmul.f32 0.2, %v1471_v60 }
 0x29e   :  { %v949_v3 = vmul.f32 0.70710677, %v945_v62  ;;  %v832_v4 = vsel %vm824_vm8, %v1470_v56, %v828_v63 }
 0x29f   :  { %954 = vst [vmem:[#allocation15 + $0x8] sm:$0xff] %v950_v1  ;;  %v948_v5 = vadd.f32 %v942_v61, %v832_v4  ;;  %v831_v6 = vsel %vm823_vm9, %v1471_v60, %v827_v2 }
 0x2a0   :  { %953 = vst [vmem:[#allocation15] sm:$0xff] %v949_v3  ;;  %v947_v7 = vadd.f32 %v937_v0, %v831_v6 }
 0x2a1   :  { %v952_v8 = vmul.f32 0.70710677, %v948_v5 }
 0x2a2   :  { %v951_v11 = vmul.f32 0.70710677, %v947_v7 }
 0x2a3   :  { %956 = vst [vmem:[#allocation15 + $0x18] sm:$0xff] %v952_v8 }
 0x2a4   :  { %955 = vst [vmem:[#allocation15 + $0x10] sm:$0xff] %v951_v11 }
 0x2a5   :  { %1641 = shalt.err (!%p1638_p10)
}
 0x2a6   :  { %s1642_s8 = scalar_lea.hbm %s1892_s7, 512 }
 0x2a7   :  { %p1643_p11 = scmp.ne.s32.totalorder %s1892_s7, %s1642_s8  ;;  %p1646_p12 = scmp.lt.u32.totalorder %s1642_s8, %s1892_s7 }
 0x2a9   :  { %p1648_p13 = pnand %p1646_p12, %p1643_p11 }
 0x2ab   :  { %1651 = shalt.err (!%p1648_p13)
}
 0x2ac   :  { %968 = dma.vmem_to_hbm [thread:$0]  %s963_s25, 512, %s1892_s7, [#allocation6], %s1664_s13, %s1664_s13, %s1665_s14  }
 0x2ad   :  { %1660 = dma.done.wait [#allocation6], 512  }
 0x2ae   :  { %1661 = vsyncadd [#allocation6], 4294966784 }
 0x2af   :  { %972 = vsyncpa [#allocation5], 1 }
 0x2b0   :  { %973 = vsyncpa [#allocation8], 1 }
 0x2b1   :  { %974 = vsyncpa [#allocation11], 1 }
 0x2b2   :  { %975 = vsyncpa [#allocation14], 1 }
 0x2b3   :  { %976 = vsyncpa [#allocation6], 1 }

</bundles_post_ra>
